<compile_context>
chip_gen: v7x
topology: tpu7x:2x2x1
jax: 0.10.0
libtpu: 0.0.40
codegen_flags: <defaults>
</compile_context>

<pallas_src>
import functools

import jax
import jax.numpy as jnp
from jax import lax
from jax.experimental import pallas as pl
from jax.experimental.pallas import tpu as pltpu


def _round_up(x, m):
    return ((x + m - 1) // m) * m


def _gru_chunk_kernel(x_ref, wih_ref, whh_ref, bias_ref, bhn_ref,
                      h_out_ref, h_state, gx_scr,
                      *, hp, n_steps, b_blk, seq, ragged, unroll):
    """One time-chunk of the GRU recurrence for one batch block.

    Grid = (batch_blocks ["parallel"], time_chunks ["arbitrary"]).
      x_ref    : (T, b_blk, C)   raw input chunk, time-major, f32
      wih_ref  : (C, 3*Hp)       gate-major input weights, f32
      whh_ref  : (Hp, 3*Hp)      gate-major recurrent weights, bf16 (MXU operand)
      bias_ref : (1, 3*Hp)       b_ih (+ b_hr / b_hz folded), f32
      bhn_ref  : (1, Hp)         b_hn (sits inside r * (...)), f32
      h_out_ref: (b_blk, Hp)     final hidden state for this batch block
      h_state  : VMEM scratch    hidden state carried across time chunks
      gx_scr   : VMEM scratch    (T*b_blk, 3*Hp) per-chunk input projection
    """
    c = pl.program_id(1)                      # time-chunk index (serial axis)

    @pl.when(c == 0)
    def _():
        h_state[...] = jnp.zeros_like(h_state)

    # Time-parallel input projection, ONCE per chunk (one large-M MXU matmul).
    # Streams raw x (C lanes) instead of a pre-materialized (seq, b, 3*Hp) gx slab,
    # eliminating that intermediate's HBM write + re-read entirely.
    xc = x_ref[...]                                                   # (T, bb, C)
    proj = jnp.dot(xc.reshape(n_steps * b_blk, xc.shape[-1]),
                   wih_ref[...], preferred_element_type=jnp.float32)  # (T*bb, 3*Hp)
    gx_scr[...] = proj + bias_ref[...]                                # biases folded in

    # Hoist the b_hn broadcast out of the (unrolled) serial loop.
    bhn = jnp.broadcast_to(bhn_ref[...], (b_blk, hp))

    def step(t, h):
        off = pl.multiple_of(t * b_blk, b_blk)
        g = gx_scr[pl.ds(off, b_blk), :]                              # (bb, 3*Hp)
        # bf16 MXU operands, f32 accumulation: fewer MXU passes on the serial
        # critical path.  whh_ref is read per step (VMEM operand) to keep vreg
        # pressure low -- vld slots are far from saturated in this loop.
        gh = jnp.dot(h.astype(jnp.bfloat16), whh_ref[...],
                     preferred_element_type=jnp.float32)              # (bb, 3*Hp)
        # Fused r/z pre-activation: one add + one sigmoid over the first 2*Hp lanes.
        rz = jax.nn.sigmoid(g[:, :2 * hp] + gh[:, :2 * hp])
        r = rz[:, :hp]
        z = rz[:, hp:]
        n = jnp.tanh(g[:, 2 * hp:] + r * (gh[:, 2 * hp:] + bhn))
        h_new = (1.0 - z) * n + z * h
        if ragged:
            # Padded timesteps at the ragged tail are exact no-ops.
            h_new = jnp.where(c * n_steps + t < seq, h_new, h)
        return h_new

    # TODO(synk): if the bundle dump shows per-step RHS weight reloads, keep whh
    # resident in the MXU weight registers (pltpu.matmul_push_rhs once per chunk +
    # matmul_acc_lhs / matmul_pop per step).
    h = lax.fori_loop(0, n_steps, step, h_state[...], unroll=unroll)
    h_state[...] = h
    h_out_ref[...] = h          # resident output block; HBM writeback only at the end


def gru_encoder_forward(x, batch, params, *, in_channels, hid_dim, eps=1e-5,
                        time_chunk=256, batch_block=None):
    """x: (b*in_channels, seq) float32 -> h: (b, hid_dim) float32.

    `batch` is accepted for interface parity with the PyTorch module but is not read on
    the host: b is derived statically from shapes (no device->host sync).
    On v7x pass e.g. batch_block=round_up(cdiv(b, 2), 8) to shard the "parallel" batch
    grid axis across both TensorCores (BatchNorm already lives outside the kernel).
    """
    del batch
    nb, seq = x.shape
    C = in_channels
    b = nb // C                                 # static
    H = hid_dim
    Hp = _round_up(H, 128)                      # 128-lane aligned gate width
    Cl = _round_up(C, 128)                      # lane-padded C (VMEM accounting only)

    # Batch blocking (single block by default).
    if batch_block is None:
        bb = _round_up(b, 8)
    else:
        bb = _round_up(min(batch_block, _round_up(b, 8)), 8)
    b_pad = _round_up(_round_up(b, 8), bb)
    n_bblk = b_pad // bb

    # Adaptive time-chunk: bound the double-buffered x slab + per-chunk projection
    # scratch (plus dot-result headroom) to a budget that fits v5e / v6e / v7x.
    slab_budget = 12 * 1024 * 1024
    per_step_bytes = bb * (2 * Cl * 4 + 2 * 3 * Hp * 4)
    T = int(max(1, min(time_chunk, seq, slab_budget // per_step_bytes)))
    n_chunks = pl.cdiv(seq, T)
    seq_pad = n_chunks * T
    ragged = seq_pad != seq

    # Host-side prep is tiny: raw x re-layout + weights only (no gx intermediate).
    xt = x.reshape(b, C, seq).astype(jnp.float32).transpose(2, 0, 1)   # (seq, b, C)
    xt = jnp.pad(xt, ((0, seq_pad - seq), (0, b_pad - b), (0, 0)))

    w_ih = params["w_ih"].astype(jnp.float32)   # (3H, C)  gate order (r, z, n)
    w_hh = params["w_hh"].astype(jnp.float32)   # (3H, H)
    b_ih = params["b_ih"].astype(jnp.float32)   # (3H,)
    b_hh = params["b_hh"].astype(jnp.float32)   # (3H,)

    def gsplit(a, axis=0):
        return (lax.slice_in_dim(a, 0, H, axis=axis),
                lax.slice_in_dim(a, H, 2 * H, axis=axis),
                lax.slice_in_dim(a, 2 * H, 3 * H, axis=axis))

    wih_r, wih_z, wih_n = gsplit(w_ih)
    whh_r, whh_z, whh_n = gsplit(w_hh)
    bih_r, bih_z, bih_n = gsplit(b_ih)
    bhh_r, bhh_z, bhh_n = gsplit(b_hh)

    # Gate-major, 128-lane-aligned layouts: r/z/n slices are aligned vreg reads.
    wih_g = jnp.zeros((C, 3 * Hp), jnp.float32)
    wih_g = wih_g.at[:, 0 * Hp:0 * Hp + H].set(wih_r.T)
    wih_g = wih_g.at[:, 1 * Hp:1 * Hp + H].set(wih_z.T)
    wih_g = wih_g.at[:, 2 * Hp:2 * Hp + H].set(wih_n.T)

    # Fold b_ih fully and b_hr / b_hz (they sit outside the r-multiplication).
    bias_g = jnp.zeros((1, 3 * Hp), jnp.float32)
    bias_g = bias_g.at[0, 0 * Hp:0 * Hp + H].set(bih_r + bhh_r)
    bias_g = bias_g.at[0, 1 * Hp:1 * Hp + H].set(bih_z + bhh_z)
    bias_g = bias_g.at[0, 2 * Hp:2 * Hp + H].set(bih_n)

    # Recurrent weights as bf16 MXU operands (f32 accumulation in-kernel).
    whh_g = jnp.zeros((Hp, 3 * Hp), jnp.float32)
    whh_g = whh_g.at[:H, 0 * Hp:0 * Hp + H].set(whh_r.T)
    whh_g = whh_g.at[:H, 1 * Hp:1 * Hp + H].set(whh_z.T)
    whh_g = whh_g.at[:H, 2 * Hp:2 * Hp + H].set(whh_n.T)
    whh_g = whh_g.astype(jnp.bfloat16)

    bhn_g = jnp.zeros((1, Hp), jnp.float32).at[0, :H].set(bhh_n)

    unroll = 8 if bb <= 64 else (4 if bb <= 256 else 2)

    kernel = functools.partial(
        _gru_chunk_kernel, hp=Hp, n_steps=T, b_blk=bb, seq=seq,
        ragged=ragged, unroll=unroll)

    vmem_est = (2 * T * bb * Cl * 4            # x slab (double-buffered, lane-padded)
                + 2 * T * bb * 3 * Hp * 4      # gx scratch + dot-result headroom
                + Hp * 3 * Hp * 2              # whh (bf16)
                + Cl * 3 * Hp * 4              # wih
                + 4 * bb * Hp * 4              # h_state scratch + output block
                + 8 * 3 * Hp * 4)              # small bias operands
    vmem_limit = int(min(max(2 * vmem_est, 32 << 20), 48 << 20))

    h_pad = pl.pallas_call(
        kernel,
        out_shape=jax.ShapeDtypeStruct((b_pad, Hp), jnp.float32),
        grid_spec=pltpu.PrefetchScalarGridSpec(
            num_scalar_prefetch=0,
            grid=(n_bblk, n_chunks),
            in_specs=[
                pl.BlockSpec((T, bb, C), lambda i, c: (c, i, 0)),     # raw x chunk
                pl.BlockSpec((C, 3 * Hp), lambda i, c: (0, 0)),       # W_ih (gate-major)
                pl.BlockSpec((Hp, 3 * Hp), lambda i, c: (0, 0)),      # W_hh (bf16)
                pl.BlockSpec((1, 3 * Hp), lambda i, c: (0, 0)),       # folded biases
                pl.BlockSpec((1, Hp), lambda i, c: (0, 0)),           # b_hn
            ],
            out_specs=pl.BlockSpec((bb, Hp), lambda i, c: (i, 0)),
            scratch_shapes=[
                pltpu.VMEM((bb, Hp), jnp.float32),            # h carried across chunks
                pltpu.VMEM((T * bb, 3 * Hp), jnp.float32),    # per-chunk projection
            ],
        ),
        compiler_params=pltpu.CompilerParams(
            dimension_semantics=("parallel", "arbitrary"),
            vmem_limit_bytes=vmem_limit,
        ),
    )(xt, wih_g, whh_g, bias_g, bhn_g)

    # BatchNorm1d (training-mode biased batch stats) + ReLU as a tiny XLA epilogue
    # over the real (b, H) rows only (padded rows/columns never enter the stats).
    h = h_pad[:b, :H]
    mean = jnp.mean(h, axis=0, keepdims=True)
    var = jnp.mean((h - mean) ** 2, axis=0, keepdims=True)
    h = (h - mean) * lax.rsqrt(var + eps)
    h = h * params["bn_gamma"].astype(jnp.float32) + params["bn_beta"].astype(jnp.float32)
    return jnp.maximum(h, 0.0)


def gru_encoder_reference(x, params, *, in_channels, hid_dim, eps=1e-5,
                          recurrent_matmul_dtype=jnp.float32):
    """Pure-JAX reference (PyTorch GRU + BatchNorm1d(train) + ReLU semantics).

    `recurrent_matmul_dtype` mirrors the kernel's MXU operand precision (bf16 operands,
    f32 accumulation); all other math stays f32.
    """
    nb, seq = x.shape
    b = nb // in_channels
    xm = x.reshape(b, in_channels, seq).transpose(0, 2, 1)       # (b, seq, in)
    wih, whh = params["w_ih"], params["w_hh"]
    bih, bhh = params["b_ih"], params["b_hh"]
    H = hid_dim
    whh_m = whh.astype(recurrent_matmul_dtype)

    def step(h, x_t):
        gx = x_t @ wih.T + bih
        gh = jnp.dot(h.astype(recurrent_matmul_dtype), whh_m.T,
                     preferred_element_type=jnp.float32) + bhh
        r = jax.nn.sigmoid(gx[:, :H] + gh[:, :H])
        z = jax.nn.sigmoid(gx[:, H:2 * H] + gh[:, H:2 * H])
        n = jnp.tanh(gx[:, 2 * H:] + r * gh[:, 2 * H:])
        h_new = (1.0 - z) * n + z * h
        return h_new, None

    h0 = jnp.zeros((b, H), jnp.float32)
    h, _ = lax.scan(step, h0, jnp.transpose(xm, (1, 0, 2)))
    mean = jnp.mean(h, axis=0, keepdims=True)
    var = jnp.mean((h - mean) ** 2, axis=0, keepdims=True)
    h = (h - mean) / jnp.sqrt(var + eps) * params["bn_gamma"] + params["bn_beta"]
    return jnp.maximum(h, 0.0)


def init_params(key, in_channels, hid_dim):
    k1, k2, k3, k4 = jax.random.split(key, 4)
    s = 1.0 / jnp.sqrt(hid_dim)
    return {
        "w_ih": jax.random.uniform(k1, (3 * hid_dim, in_channels), jnp.float32, -s, s),
        "w_hh": jax.random.uniform(k2, (3 * hid_dim, hid_dim), jnp.float32, -s, s),
        "b_ih": jax.random.uniform(k3, (3 * hid_dim,), jnp.float32, -s, s),
        "b_hh": jax.random.uniform(k4, (3 * hid_dim,), jnp.float32, -s, s),
        "bn_gamma": jnp.ones((hid_dim,), jnp.float32),
        "bn_beta": jnp.zeros((hid_dim,), jnp.float32),
    }


if __name__ == "__main__":
    # Small, deterministic example: b=2 graphs, in_channels=4, seq=20, hid=32.
    # time_chunk=8 exercises the multi-chunk hidden-state carry AND the ragged tail.
    IN_CH, HID, B, SEQ = 4, 32, 2, 20
    key = jax.random.PRNGKey(0)
    kx, kp = jax.random.split(key)

    x = jax.random.normal(kx, (B * IN_CH, SEQ), jnp.float32)     # (b*in_channels, seq)
    batch = jnp.repeat(jnp.arange(B, dtype=jnp.int32), IN_CH)    # node -> graph index
    params = init_params(kp, IN_CH, HID)

    fwd = jax.jit(functools.partial(gru_encoder_forward, in_channels=IN_CH,
                                    hid_dim=HID, time_chunk=8))
    h = jax.block_until_ready(fwd(x, batch, params))

    # Reference uses the same MXU precision choice (bf16 operands, f32 accumulation).
    h_ref = gru_encoder_reference(x, params, in_channels=IN_CH, hid_dim=HID,
                                  recurrent_matmul_dtype=jnp.bfloat16)
    assert h.shape == (B, HID)
    assert jnp.allclose(h, h_ref, rtol=1e-2, atol=1e-2), "mismatch vs reference"

    # TODO(synk): 'univariate' mode (per-node GRU list), GraphNorm branch, and the
    # optional initial-state `c` / return_all=(out, h) paths are not implemented.
    print("KERNEL_OK")
</pallas_src>

<mosaic_0001>
module attributes {stable_mosaic.version = 11 : i64} {
  func.func @_gru_chunk_kernel(%arg0: i32, %arg1: i32, %arg2: memref<8x8x4xf32, #tpu.memory_space<vmem>>, %arg3: memref<4x384xf32, #tpu.memory_space<vmem>>, %arg4: memref<128x384xbf16, #tpu.memory_space<vmem>>, %arg5: memref<1x384xf32, #tpu.memory_space<vmem>>, %arg6: memref<1x128xf32, #tpu.memory_space<vmem>>, %arg7: memref<8x128xf32, #tpu.memory_space<vmem>>, %arg8: memref<8x128xf32, #tpu.memory_space<vmem>>, %arg9: memref<64x384xf32, #tpu.memory_space<vmem>>) attributes {dimension_semantics = [#tpu.dimension_semantics<parallel>, #tpu.dimension_semantics<arbitrary>], iteration_bounds = array<i64: 1, 3>, scalar_prefetch = 0 : i64, scratch_operands = 2 : i64, tpu.core_type = #tpu.core_type<tc>, window_params = [{transform_indices = @transform_0, window_bounds = array<i64: 8, 8, 4>}, {pipeline_mode = #tpu.pipeline_mode<synchronous>, transform_indices = @transform_1, window_bounds = array<i64: 4, 384>}, {pipeline_mode = #tpu.pipeline_mode<synchronous>, transform_indices = @transform_2, window_bounds = array<i64: 128, 384>}, {pipeline_mode = #tpu.pipeline_mode<synchronous>, transform_indices = @transform_3, window_bounds = array<i64: 1, 384>}, {pipeline_mode = #tpu.pipeline_mode<synchronous>, transform_indices = @transform_4, window_bounds = array<i64: 1, 128>}, {transform_indices = @transform_5, window_bounds = array<i64: 8, 128>}]} {
    %c0_i32 = arith.constant 0 : i32
    %0 = arith.cmpi eq, %arg1, %c0_i32 : i32
    %1 = arith.extui %0 : i1 to i32
    %c0_i32_0 = arith.constant 0 : i32
    %2 = arith.cmpi ne, %1, %c0_i32_0 : i32
    scf.if %2 {
      %cst_89 = arith.constant 0.000000e+00 : f32
      %273 = vector.broadcast %cst_89 : f32 to vector<8x128xf32>
      %c0_90 = arith.constant 0 : index
      %c0_91 = arith.constant 0 : index
      %274 = vector.load %arg8[%c0_90, %c0_91] : memref<8x128xf32, #tpu.memory_space<vmem>>, vector<8x128xf32>
      tpu.vector_store %arg8[%c0_90, %c0_91], %273 {strides = array<i32>} : memref<8x128xf32, #tpu.memory_space<vmem>>, vector<8x128xf32>,
    } else {
    }
    %c0 = arith.constant 0 : index
    %c0_1 = arith.constant 0 : index
    %c0_2 = arith.constant 0 : index
    %3 = vector.load %arg2[%c0, %c0_1, %c0_2] : memref<8x8x4xf32, #tpu.memory_space<vmem>>, vector<8x8x4xf32>
    %4 = vector.shape_cast %3 : vector<8x8x4xf32> to vector<64x4xf32>
    %c0_3 = arith.constant 0 : index
    %c0_4 = arith.constant 0 : index
    %5 = vector.load %arg3[%c0_3, %c0_4] : memref<4x384xf32, #tpu.memory_space<vmem>>, vector<4x384xf32>
    %cst = arith.constant dense<0.000000e+00> : vector<64x384xf32>
    %6 = tpu.matmul %4, %5, %cst {dimension_numbers = #tpu.dot_dimension_numbers<[1], [0], [0], [1], [0, 0, 1, 1], [], []>} : vector<64x4xf32>, vector<4x384xf32>, vector<64x384xf32> -> vector<64x384xf32>
    %c0_5 = arith.constant 0 : index
    %c0_6 = arith.constant 0 : index
    %7 = vector.load %arg5[%c0_5, %c0_6] : memref<1x384xf32, #tpu.memory_space<vmem>>, vector<1x384xf32>
    %8 = vector.broadcast %7 : vector<1x384xf32> to vector<64x384xf32>
    %9 = arith.addf %6, %8 : vector<64x384xf32>
    %c0_7 = arith.constant 0 : index
    %c0_8 = arith.constant 0 : index
    %10 = vector.load %arg9[%c0_7, %c0_8] : memref<64x384xf32, #tpu.memory_space<vmem>>, vector<64x384xf32>
    tpu.vector_store %arg9[%c0_7, %c0_8], %9 {strides = array<i32>} : memref<64x384xf32, #tpu.memory_space<vmem>>, vector<64x384xf32>,
    %c0_9 = arith.constant 0 : index
    %c0_10 = arith.constant 0 : index
    %11 = vector.load %arg6[%c0_9, %c0_10] : memref<1x128xf32, #tpu.memory_space<vmem>>, vector<1x128xf32>
    %12 = vector.shape_cast %11 : vector<1x128xf32> to vector<1x128xf32>
    %13 = vector.broadcast %12 : vector<1x128xf32> to vector<8x128xf32>
    %c0_11 = arith.constant 0 : index
    %c0_12 = arith.constant 0 : index
    %14 = vector.load %arg8[%c0_11, %c0_12] : memref<8x128xf32, #tpu.memory_space<vmem>>, vector<8x128xf32>
    %c0_i32_13 = arith.constant 0 : i32
    %c8_i32 = arith.constant 8 : i32
    %15 = arith.muli %c0_i32_13, %c8_i32 : i32
    %16 = tpu.assume_multiple %15, 8 : i32
    %17 = arith.index_cast %16 : i32 to index
    %c0_14 = arith.constant 0 : index
    %18 = vector.load %arg9[%17, %c0_14] : memref<64x384xf32, #tpu.memory_space<vmem>>, vector<8x384xf32>
    %19 = arith.truncf %14 : vector<8x128xf32> to vector<8x128xbf16>
    %c0_15 = arith.constant 0 : index
    %c0_16 = arith.constant 0 : index
    %20 = vector.load %arg4[%c0_15, %c0_16] : memref<128x384xbf16, #tpu.memory_space<vmem>>, vector<128x384xbf16>
    %cst_17 = arith.constant dense<0.000000e+00> : vector<8x384xf32>
    %21 = tpu.matmul %19, %20, %cst_17 {dimension_numbers = #tpu.dot_dimension_numbers<[1], [0], [0], [1], [0, 0, 1, 1], [], []>} : vector<8x128xbf16>, vector<128x384xbf16>, vector<8x384xf32> -> vector<8x384xf32>
    %22 = vector.extract_strided_slice %18 {offsets = [0, 0], sizes = [8, 256], strides = [1, 1]} : vector<8x384xf32> to vector<8x256xf32>
    %23 = vector.extract_strided_slice %21 {offsets = [0, 0], sizes = [8, 256], strides = [1, 1]} : vector<8x384xf32> to vector<8x256xf32>
    %24 = arith.addf %22, %23 : vector<8x256xf32>
    %25 = arith.negf %24 : vector<8x256xf32>
    %26 = math.exp %25 : vector<8x256xf32>
    %cst_18 = arith.constant 1.000000e+00 : f32
    %27 = vector.broadcast %cst_18 : f32 to vector<8x256xf32>
    %28 = arith.addf %27, %26 : vector<8x256xf32>
    %29 = arith.divf %27, %28 : vector<8x256xf32>
    %30 = vector.extract_strided_slice %29 {offsets = [0, 0], sizes = [8, 128], strides = [1, 1]} : vector<8x256xf32> to vector<8x128xf32>
    %31 = vector.extract_strided_slice %29 {offsets = [0, 128], sizes = [8, 128], strides = [1, 1]} : vector<8x256xf32> to vector<8x128xf32>
    %32 = vector.extract_strided_slice %18 {offsets = [0, 256], sizes = [8, 128], strides = [1, 1]} : vector<8x384xf32> to vector<8x128xf32>
    %33 = vector.extract_strided_slice %21 {offsets = [0, 256], sizes = [8, 128], strides = [1, 1]} : vector<8x384xf32> to vector<8x128xf32>
    %34 = arith.addf %33, %13 : vector<8x128xf32>
    %35 = arith.mulf %30, %34 : vector<8x128xf32>
    %36 = arith.addf %32, %35 : vector<8x128xf32>
    %37 = math.tanh %36 : vector<8x128xf32>
    %cst_19 = arith.constant 1.000000e+00 : f32
    %38 = vector.broadcast %cst_19 : f32 to vector<8x128xf32>
    %39 = arith.subf %38, %31 : vector<8x128xf32>
    %40 = arith.mulf %39, %37 : vector<8x128xf32>
    %41 = arith.mulf %31, %14 : vector<8x128xf32>
    %42 = arith.addf %40, %41 : vector<8x128xf32>
    %c8_i32_20 = arith.constant 8 : i32
    %43 = arith.muli %arg1, %c8_i32_20 : i32
    %44 = arith.addi %43, %c0_i32_13 : i32
    %c20_i32 = arith.constant 20 : i32
    %45 = arith.cmpi slt, %44, %c20_i32 : i32
    %46 = arith.select %45, %42, %14 : vector<8x128xf32>
    %c1_i32 = arith.constant 1 : i32
    %c8_i32_21 = arith.constant 8 : i32
    %47 = arith.muli %c1_i32, %c8_i32_21 : i32
    %48 = tpu.assume_multiple %47, 8 : i32
    %49 = arith.index_cast %48 : i32 to index
    %c0_22 = arith.constant 0 : index
    %50 = vector.load %arg9[%49, %c0_22] : memref<64x384xf32, #tpu.memory_space<vmem>>, vector<8x384xf32>
    %51 = arith.truncf %46 : vector<8x128xf32> to vector<8x128xbf16>
    %c0_23 = arith.constant 0 : index
    %c0_24 = arith.constant 0 : index
    %52 = vector.load %arg4[%c0_23, %c0_24] : memref<128x384xbf16, #tpu.memory_space<vmem>>, vector<128x384xbf16>
    %cst_25 = arith.constant dense<0.000000e+00> : vector<8x384xf32>
    %53 = tpu.matmul %51, %52, %cst_25 {dimension_numbers = #tpu.dot_dimension_numbers<[1], [0], [0], [1], [0, 0, 1, 1], [], []>} : vector<8x128xbf16>, vector<128x384xbf16>, vector<8x384xf32> -> vector<8x384xf32>
    %54 = vector.extract_strided_slice %50 {offsets = [0, 0], sizes = [8, 256], strides = [1, 1]} : vector<8x384xf32> to vector<8x256xf32>
    %55 = vector.extract_strided_slice %53 {offsets = [0, 0], sizes = [8, 256], strides = [1, 1]} : vector<8x384xf32> to vector<8x256xf32>
    %56 = arith.addf %54, %55 : vector<8x256xf32>
    %57 = arith.negf %56 : vector<8x256xf32>
    %58 = math.exp %57 : vector<8x256xf32>
    %cst_26 = arith.constant 1.000000e+00 : f32
    %59 = vector.broadcast %cst_26 : f32 to vector<8x256xf32>
    %60 = arith.addf %59, %58 : vector<8x256xf32>
    %61 = arith.divf %59, %60 : vector<8x256xf32>
    %62 = vector.extract_strided_slice %61 {offsets = [0, 0], sizes = [8, 128], strides = [1, 1]} : vector<8x256xf32> to vector<8x128xf32>
    %63 = vector.extract_strided_slice %61 {offsets = [0, 128], sizes = [8, 128], strides = [1, 1]} : vector<8x256xf32> to vector<8x128xf32>
    %64 = vector.extract_strided_slice %50 {offsets = [0, 256], sizes = [8, 128], strides = [1, 1]} : vector<8x384xf32> to vector<8x128xf32>
    %65 = vector.extract_strided_slice %53 {offsets = [0, 256], sizes = [8, 128], strides = [1, 1]} : vector<8x384xf32> to vector<8x128xf32>
    %66 = arith.addf %65, %13 : vector<8x128xf32>
    %67 = arith.mulf %62, %66 : vector<8x128xf32>
    %68 = arith.addf %64, %67 : vector<8x128xf32>
    %69 = math.tanh %68 : vector<8x128xf32>
    %cst_27 = arith.constant 1.000000e+00 : f32
    %70 = vector.broadcast %cst_27 : f32 to vector<8x128xf32>
    %71 = arith.subf %70, %63 : vector<8x128xf32>
    %72 = arith.mulf %71, %69 : vector<8x128xf32>
    %73 = arith.mulf %63, %46 : vector<8x128xf32>
    %74 = arith.addf %72, %73 : vector<8x128xf32>
    %c8_i32_28 = arith.constant 8 : i32
    %75 = arith.muli %arg1, %c8_i32_28 : i32
    %76 = arith.addi %75, %c1_i32 : i32
    %c20_i32_29 = arith.constant 20 : i32
    %77 = arith.cmpi slt, %76, %c20_i32_29 : i32
    %78 = arith.select %77, %74, %46 : vector<8x128xf32>
    %c2_i32 = arith.constant 2 : i32
    %c8_i32_30 = arith.constant 8 : i32
    %79 = arith.muli %c2_i32, %c8_i32_30 : i32
    %80 = tpu.assume_multiple %79, 8 : i32
    %81 = arith.index_cast %80 : i32 to index
    %c0_31 = arith.constant 0 : index
    %82 = vector.load %arg9[%81, %c0_31] : memref<64x384xf32, #tpu.memory_space<vmem>>, vector<8x384xf32>
    %83 = arith.truncf %78 : vector<8x128xf32> to vector<8x128xbf16>
    %c0_32 = arith.constant 0 : index
    %c0_33 = arith.constant 0 : index
    %84 = vector.load %arg4[%c0_32, %c0_33] : memref<128x384xbf16, #tpu.memory_space<vmem>>, vector<128x384xbf16>
    %cst_34 = arith.constant dense<0.000000e+00> : vector<8x384xf32>
    %85 = tpu.matmul %83, %84, %cst_34 {dimension_numbers = #tpu.dot_dimension_numbers<[1], [0], [0], [1], [0, 0, 1, 1], [], []>} : vector<8x128xbf16>, vector<128x384xbf16>, vector<8x384xf32> -> vector<8x384xf32>
    %86 = vector.extract_strided_slice %82 {offsets = [0, 0], sizes = [8, 256], strides = [1, 1]} : vector<8x384xf32> to vector<8x256xf32>
    %87 = vector.extract_strided_slice %85 {offsets = [0, 0], sizes = [8, 256], strides = [1, 1]} : vector<8x384xf32> to vector<8x256xf32>
    %88 = arith.addf %86, %87 : vector<8x256xf32>
    %89 = arith.negf %88 : vector<8x256xf32>
    %90 = math.exp %89 : vector<8x256xf32>
    %cst_35 = arith.constant 1.000000e+00 : f32
    %91 = vector.broadcast %cst_35 : f32 to vector<8x256xf32>
    %92 = arith.addf %91, %90 : vector<8x256xf32>
    %93 = arith.divf %91, %92 : vector<8x256xf32>
    %94 = vector.extract_strided_slice %93 {offsets = [0, 0], sizes = [8, 128], strides = [1, 1]} : vector<8x256xf32> to vector<8x128xf32>
    %95 = vector.extract_strided_slice %93 {offsets = [0, 128], sizes = [8, 128], strides = [1, 1]} : vector<8x256xf32> to vector<8x128xf32>
    %96 = vector.extract_strided_slice %82 {offsets = [0, 256], sizes = [8, 128], strides = [1, 1]} : vector<8x384xf32> to vector<8x128xf32>
    %97 = vector.extract_strided_slice %85 {offsets = [0, 256], sizes = [8, 128], strides = [1, 1]} : vector<8x384xf32> to vector<8x128xf32>
    %98 = arith.addf %97, %13 : vector<8x128xf32>
    %99 = arith.mulf %94, %98 : vector<8x128xf32>
    %100 = arith.addf %96, %99 : vector<8x128xf32>
    %101 = math.tanh %100 : vector<8x128xf32>
    %cst_36 = arith.constant 1.000000e+00 : f32
    %102 = vector.broadcast %cst_36 : f32 to vector<8x128xf32>
    %103 = arith.subf %102, %95 : vector<8x128xf32>
    %104 = arith.mulf %103, %101 : vector<8x128xf32>
    %105 = arith.mulf %95, %78 : vector<8x128xf32>
    %106 = arith.addf %104, %105 : vector<8x128xf32>
    %c8_i32_37 = arith.constant 8 : i32
    %107 = arith.muli %arg1, %c8_i32_37 : i32
    %108 = arith.addi %107, %c2_i32 : i32
    %c20_i32_38 = arith.constant 20 : i32
    %109 = arith.cmpi slt, %108, %c20_i32_38 : i32
    %110 = arith.select %109, %106, %78 : vector<8x128xf32>
    %c3_i32 = arith.constant 3 : i32
    %c8_i32_39 = arith.constant 8 : i32
    %111 = arith.muli %c3_i32, %c8_i32_39 : i32
    %112 = tpu.assume_multiple %111, 8 : i32
    %113 = arith.index_cast %112 : i32 to index
    %c0_40 = arith.constant 0 : index
    %114 = vector.load %arg9[%113, %c0_40] : memref<64x384xf32, #tpu.memory_space<vmem>>, vector<8x384xf32>
    %115 = arith.truncf %110 : vector<8x128xf32> to vector<8x128xbf16>
    %c0_41 = arith.constant 0 : index
    %c0_42 = arith.constant 0 : index
    %116 = vector.load %arg4[%c0_41, %c0_42] : memref<128x384xbf16, #tpu.memory_space<vmem>>, vector<128x384xbf16>
    %cst_43 = arith.constant dense<0.000000e+00> : vector<8x384xf32>
    %117 = tpu.matmul %115, %116, %cst_43 {dimension_numbers = #tpu.dot_dimension_numbers<[1], [0], [0], [1], [0, 0, 1, 1], [], []>} : vector<8x128xbf16>, vector<128x384xbf16>, vector<8x384xf32> -> vector<8x384xf32>
    %118 = vector.extract_strided_slice %114 {offsets = [0, 0], sizes = [8, 256], strides = [1, 1]} : vector<8x384xf32> to vector<8x256xf32>
    %119 = vector.extract_strided_slice %117 {offsets = [0, 0], sizes = [8, 256], strides = [1, 1]} : vector<8x384xf32> to vector<8x256xf32>
    %120 = arith.addf %118, %119 : vector<8x256xf32>
    %121 = arith.negf %120 : vector<8x256xf32>
    %122 = math.exp %121 : vector<8x256xf32>
    %cst_44 = arith.constant 1.000000e+00 : f32
    %123 = vector.broadcast %cst_44 : f32 to vector<8x256xf32>
    %124 = arith.addf %123, %122 : vector<8x256xf32>
    %125 = arith.divf %123, %124 : vector<8x256xf32>
    %126 = vector.extract_strided_slice %125 {offsets = [0, 0], sizes = [8, 128], strides = [1, 1]} : vector<8x256xf32> to vector<8x128xf32>
    %127 = vector.extract_strided_slice %125 {offsets = [0, 128], sizes = [8, 128], strides = [1, 1]} : vector<8x256xf32> to vector<8x128xf32>
    %128 = vector.extract_strided_slice %114 {offsets = [0, 256], sizes = [8, 128], strides = [1, 1]} : vector<8x384xf32> to vector<8x128xf32>
    %129 = vector.extract_strided_slice %117 {offsets = [0, 256], sizes = [8, 128], strides = [1, 1]} : vector<8x384xf32> to vector<8x128xf32>
    %130 = arith.addf %129, %13 : vector<8x128xf32>
    %131 = arith.mulf %126, %130 : vector<8x128xf32>
    %132 = arith.addf %128, %131 : vector<8x128xf32>
    %133 = math.tanh %132 : vector<8x128xf32>
    %cst_45 = arith.constant 1.000000e+00 : f32
    %134 = vector.broadcast %cst_45 : f32 to vector<8x128xf32>
    %135 = arith.subf %134, %127 : vector<8x128xf32>
    %136 = arith.mulf %135, %133 : vector<8x128xf32>
    %137 = arith.mulf %127, %110 : vector<8x128xf32>
    %138 = arith.addf %136, %137 : vector<8x128xf32>
    %c8_i32_46 = arith.constant 8 : i32
    %139 = arith.muli %arg1, %c8_i32_46 : i32
    %140 = arith.addi %139, %c3_i32 : i32
    %c20_i32_47 = arith.constant 20 : i32
    %141 = arith.cmpi slt, %140, %c20_i32_47 : i32
    %142 = arith.select %141, %138, %110 : vector<8x128xf32>
    %c4_i32 = arith.constant 4 : i32
    %c8_i32_48 = arith.constant 8 : i32
    %143 = arith.muli %c4_i32, %c8_i32_48 : i32
    %144 = tpu.assume_multiple %143, 8 : i32
    %145 = arith.index_cast %144 : i32 to index
    %c0_49 = arith.constant 0 : index
    %146 = vector.load %arg9[%145, %c0_49] : memref<64x384xf32, #tpu.memory_space<vmem>>, vector<8x384xf32>
    %147 = arith.truncf %142 : vector<8x128xf32> to vector<8x128xbf16>
    %c0_50 = arith.constant 0 : index
    %c0_51 = arith.constant 0 : index
    %148 = vector.load %arg4[%c0_50, %c0_51] : memref<128x384xbf16, #tpu.memory_space<vmem>>, vector<128x384xbf16>
    %cst_52 = arith.constant dense<0.000000e+00> : vector<8x384xf32>
    %149 = tpu.matmul %147, %148, %cst_52 {dimension_numbers = #tpu.dot_dimension_numbers<[1], [0], [0], [1], [0, 0, 1, 1], [], []>} : vector<8x128xbf16>, vector<128x384xbf16>, vector<8x384xf32> -> vector<8x384xf32>
    %150 = vector.extract_strided_slice %146 {offsets = [0, 0], sizes = [8, 256], strides = [1, 1]} : vector<8x384xf32> to vector<8x256xf32>
    %151 = vector.extract_strided_slice %149 {offsets = [0, 0], sizes = [8, 256], strides = [1, 1]} : vector<8x384xf32> to vector<8x256xf32>
    %152 = arith.addf %150, %151 : vector<8x256xf32>
    %153 = arith.negf %152 : vector<8x256xf32>
    %154 = math.exp %153 : vector<8x256xf32>
    %cst_53 = arith.constant 1.000000e+00 : f32
    %155 = vector.broadcast %cst_53 : f32 to vector<8x256xf32>
    %156 = arith.addf %155, %154 : vector<8x256xf32>
    %157 = arith.divf %155, %156 : vector<8x256xf32>
    %158 = vector.extract_strided_slice %157 {offsets = [0, 0], sizes = [8, 128], strides = [1, 1]} : vector<8x256xf32> to vector<8x128xf32>
    %159 = vector.extract_strided_slice %157 {offsets = [0, 128], sizes = [8, 128], strides = [1, 1]} : vector<8x256xf32> to vector<8x128xf32>
    %160 = vector.extract_strided_slice %146 {offsets = [0, 256], sizes = [8, 128], strides = [1, 1]} : vector<8x384xf32> to vector<8x128xf32>
    %161 = vector.extract_strided_slice %149 {offsets = [0, 256], sizes = [8, 128], strides = [1, 1]} : vector<8x384xf32> to vector<8x128xf32>
    %162 = arith.addf %161, %13 : vector<8x128xf32>
    %163 = arith.mulf %158, %162 : vector<8x128xf32>
    %164 = arith.addf %160, %163 : vector<8x128xf32>
    %165 = math.tanh %164 : vector<8x128xf32>
    %cst_54 = arith.constant 1.000000e+00 : f32
    %166 = vector.broadcast %cst_54 : f32 to vector<8x128xf32>
    %167 = arith.subf %166, %159 : vector<8x128xf32>
    %168 = arith.mulf %167, %165 : vector<8x128xf32>
    %169 = arith.mulf %159, %142 : vector<8x128xf32>
    %170 = arith.addf %168, %169 : vector<8x128xf32>
    %c8_i32_55 = arith.constant 8 : i32
    %171 = arith.muli %arg1, %c8_i32_55 : i32
    %172 = arith.addi %171, %c4_i32 : i32
    %c20_i32_56 = arith.constant 20 : i32
    %173 = arith.cmpi slt, %172, %c20_i32_56 : i32
    %174 = arith.select %173, %170, %142 : vector<8x128xf32>
    %c5_i32 = arith.constant 5 : i32
    %c8_i32_57 = arith.constant 8 : i32
    %175 = arith.muli %c5_i32, %c8_i32_57 : i32
    %176 = tpu.assume_multiple %175, 8 : i32
    %177 = arith.index_cast %176 : i32 to index
    %c0_58 = arith.constant 0 : index
    %178 = vector.load %arg9[%177, %c0_58] : memref<64x384xf32, #tpu.memory_space<vmem>>, vector<8x384xf32>
    %179 = arith.truncf %174 : vector<8x128xf32> to vector<8x128xbf16>
    %c0_59 = arith.constant 0 : index
    %c0_60 = arith.constant 0 : index
    %180 = vector.load %arg4[%c0_59, %c0_60] : memref<128x384xbf16, #tpu.memory_space<vmem>>, vector<128x384xbf16>
    %cst_61 = arith.constant dense<0.000000e+00> : vector<8x384xf32>
    %181 = tpu.matmul %179, %180, %cst_61 {dimension_numbers = #tpu.dot_dimension_numbers<[1], [0], [0], [1], [0, 0, 1, 1], [], []>} : vector<8x128xbf16>, vector<128x384xbf16>, vector<8x384xf32> -> vector<8x384xf32>
    %182 = vector.extract_strided_slice %178 {offsets = [0, 0], sizes = [8, 256], strides = [1, 1]} : vector<8x384xf32> to vector<8x256xf32>
    %183 = vector.extract_strided_slice %181 {offsets = [0, 0], sizes = [8, 256], strides = [1, 1]} : vector<8x384xf32> to vector<8x256xf32>
    %184 = arith.addf %182, %183 : vector<8x256xf32>
    %185 = arith.negf %184 : vector<8x256xf32>
    %186 = math.exp %185 : vector<8x256xf32>
    %cst_62 = arith.constant 1.000000e+00 : f32
    %187 = vector.broadcast %cst_62 : f32 to vector<8x256xf32>
    %188 = arith.addf %187, %186 : vector<8x256xf32>
    %189 = arith.divf %187, %188 : vector<8x256xf32>
    %190 = vector.extract_strided_slice %189 {offsets = [0, 0], sizes = [8, 128], strides = [1, 1]} : vector<8x256xf32> to vector<8x128xf32>
    %191 = vector.extract_strided_slice %189 {offsets = [0, 128], sizes = [8, 128], strides = [1, 1]} : vector<8x256xf32> to vector<8x128xf32>
    %192 = vector.extract_strided_slice %178 {offsets = [0, 256], sizes = [8, 128], strides = [1, 1]} : vector<8x384xf32> to vector<8x128xf32>
    %193 = vector.extract_strided_slice %181 {offsets = [0, 256], sizes = [8, 128], strides = [1, 1]} : vector<8x384xf32> to vector<8x128xf32>
    %194 = arith.addf %193, %13 : vector<8x128xf32>
    %195 = arith.mulf %190, %194 : vector<8x128xf32>
    %196 = arith.addf %192, %195 : vector<8x128xf32>
    %197 = math.tanh %196 : vector<8x128xf32>
    %cst_63 = arith.constant 1.000000e+00 : f32
    %198 = vector.broadcast %cst_63 : f32 to vector<8x128xf32>
    %199 = arith.subf %198, %191 : vector<8x128xf32>
    %200 = arith.mulf %199, %197 : vector<8x128xf32>
    %201 = arith.mulf %191, %174 : vector<8x128xf32>
    %202 = arith.addf %200, %201 : vector<8x128xf32>
    %c8_i32_64 = arith.constant 8 : i32
    %203 = arith.muli %arg1, %c8_i32_64 : i32
    %204 = arith.addi %203, %c5_i32 : i32
    %c20_i32_65 = arith.constant 20 : i32
    %205 = arith.cmpi slt, %204, %c20_i32_65 : i32
    %206 = arith.select %205, %202, %174 : vector<8x128xf32>
    %c6_i32 = arith.constant 6 : i32
    %c8_i32_66 = arith.constant 8 : i32
    %207 = arith.muli %c6_i32, %c8_i32_66 : i32
    %208 = tpu.assume_multiple %207, 8 : i32
    %209 = arith.index_cast %208 : i32 to index
    %c0_67 = arith.constant 0 : index
    %210 = vector.load %arg9[%209, %c0_67] : memref<64x384xf32, #tpu.memory_space<vmem>>, vector<8x384xf32>
    %211 = arith.truncf %206 : vector<8x128xf32> to vector<8x128xbf16>
    %c0_68 = arith.constant 0 : index
    %c0_69 = arith.constant 0 : index
    %212 = vector.load %arg4[%c0_68, %c0_69] : memref<128x384xbf16, #tpu.memory_space<vmem>>, vector<128x384xbf16>
    %cst_70 = arith.constant dense<0.000000e+00> : vector<8x384xf32>
    %213 = tpu.matmul %211, %212, %cst_70 {dimension_numbers = #tpu.dot_dimension_numbers<[1], [0], [0], [1], [0, 0, 1, 1], [], []>} : vector<8x128xbf16>, vector<128x384xbf16>, vector<8x384xf32> -> vector<8x384xf32>
    %214 = vector.extract_strided_slice %210 {offsets = [0, 0], sizes = [8, 256], strides = [1, 1]} : vector<8x384xf32> to vector<8x256xf32>
    %215 = vector.extract_strided_slice %213 {offsets = [0, 0], sizes = [8, 256], strides = [1, 1]} : vector<8x384xf32> to vector<8x256xf32>
    %216 = arith.addf %214, %215 : vector<8x256xf32>
    %217 = arith.negf %216 : vector<8x256xf32>
    %218 = math.exp %217 : vector<8x256xf32>
    %cst_71 = arith.constant 1.000000e+00 : f32
    %219 = vector.broadcast %cst_71 : f32 to vector<8x256xf32>
    %220 = arith.addf %219, %218 : vector<8x256xf32>
    %221 = arith.divf %219, %220 : vector<8x256xf32>
    %222 = vector.extract_strided_slice %221 {offsets = [0, 0], sizes = [8, 128], strides = [1, 1]} : vector<8x256xf32> to vector<8x128xf32>
    %223 = vector.extract_strided_slice %221 {offsets = [0, 128], sizes = [8, 128], strides = [1, 1]} : vector<8x256xf32> to vector<8x128xf32>
    %224 = vector.extract_strided_slice %210 {offsets = [0, 256], sizes = [8, 128], strides = [1, 1]} : vector<8x384xf32> to vector<8x128xf32>
    %225 = vector.extract_strided_slice %213 {offsets = [0, 256], sizes = [8, 128], strides = [1, 1]} : vector<8x384xf32> to vector<8x128xf32>
    %226 = arith.addf %225, %13 : vector<8x128xf32>
    %227 = arith.mulf %222, %226 : vector<8x128xf32>
    %228 = arith.addf %224, %227 : vector<8x128xf32>
    %229 = math.tanh %228 : vector<8x128xf32>
    %cst_72 = arith.constant 1.000000e+00 : f32
    %230 = vector.broadcast %cst_72 : f32 to vector<8x128xf32>
    %231 = arith.subf %230, %223 : vector<8x128xf32>
    %232 = arith.mulf %231, %229 : vector<8x128xf32>
    %233 = arith.mulf %223, %206 : vector<8x128xf32>
    %234 = arith.addf %232, %233 : vector<8x128xf32>
    %c8_i32_73 = arith.constant 8 : i32
    %235 = arith.muli %arg1, %c8_i32_73 : i32
    %236 = arith.addi %235, %c6_i32 : i32
    %c20_i32_74 = arith.constant 20 : i32
    %237 = arith.cmpi slt, %236, %c20_i32_74 : i32
    %238 = arith.select %237, %234, %206 : vector<8x128xf32>
    %c7_i32 = arith.constant 7 : i32
    %c8_i32_75 = arith.constant 8 : i32
    %239 = arith.muli %c7_i32, %c8_i32_75 : i32
    %240 = tpu.assume_multiple %239, 8 : i32
    %241 = arith.index_cast %240 : i32 to index
    %c0_76 = arith.constant 0 : index
    %242 = vector.load %arg9[%241, %c0_76] : memref<64x384xf32, #tpu.memory_space<vmem>>, vector<8x384xf32>
    %243 = arith.truncf %238 : vector<8x128xf32> to vector<8x128xbf16>
    %c0_77 = arith.constant 0 : index
    %c0_78 = arith.constant 0 : index
    %244 = vector.load %arg4[%c0_77, %c0_78] : memref<128x384xbf16, #tpu.memory_space<vmem>>, vector<128x384xbf16>
    %cst_79 = arith.constant dense<0.000000e+00> : vector<8x384xf32>
    %245 = tpu.matmul %243, %244, %cst_79 {dimension_numbers = #tpu.dot_dimension_numbers<[1], [0], [0], [1], [0, 0, 1, 1], [], []>} : vector<8x128xbf16>, vector<128x384xbf16>, vector<8x384xf32> -> vector<8x384xf32>
    %246 = vector.extract_strided_slice %242 {offsets = [0, 0], sizes = [8, 256], strides = [1, 1]} : vector<8x384xf32> to vector<8x256xf32>
    %247 = vector.extract_strided_slice %245 {offsets = [0, 0], sizes = [8, 256], strides = [1, 1]} : vector<8x384xf32> to vector<8x256xf32>
    %248 = arith.addf %246, %247 : vector<8x256xf32>
    %249 = arith.negf %248 : vector<8x256xf32>
    %250 = math.exp %249 : vector<8x256xf32>
    %cst_80 = arith.constant 1.000000e+00 : f32
    %251 = vector.broadcast %cst_80 : f32 to vector<8x256xf32>
    %252 = arith.addf %251, %250 : vector<8x256xf32>
    %253 = arith.divf %251, %252 : vector<8x256xf32>
    %254 = vector.extract_strided_slice %253 {offsets = [0, 0], sizes = [8, 128], strides = [1, 1]} : vector<8x256xf32> to vector<8x128xf32>
    %255 = vector.extract_strided_slice %253 {offsets = [0, 128], sizes = [8, 128], strides = [1, 1]} : vector<8x256xf32> to vector<8x128xf32>
    %256 = vector.extract_strided_slice %242 {offsets = [0, 256], sizes = [8, 128], strides = [1, 1]} : vector<8x384xf32> to vector<8x128xf32>
    %257 = vector.extract_strided_slice %245 {offsets = [0, 256], sizes = [8, 128], strides = [1, 1]} : vector<8x384xf32> to vector<8x128xf32>
    %258 = arith.addf %257, %13 : vector<8x128xf32>
    %259 = arith.mulf %254, %258 : vector<8x128xf32>
    %260 = arith.addf %256, %259 : vector<8x128xf32>
    %261 = math.tanh %260 : vector<8x128xf32>
    %cst_81 = arith.constant 1.000000e+00 : f32
    %262 = vector.broadcast %cst_81 : f32 to vector<8x128xf32>
    %263 = arith.subf %262, %255 : vector<8x128xf32>
    %264 = arith.mulf %263, %261 : vector<8x128xf32>
    %265 = arith.mulf %255, %238 : vector<8x128xf32>
    %266 = arith.addf %264, %265 : vector<8x128xf32>
    %c8_i32_82 = arith.constant 8 : i32
    %267 = arith.muli %arg1, %c8_i32_82 : i32
    %268 = arith.addi %267, %c7_i32 : i32
    %c20_i32_83 = arith.constant 20 : i32
    %269 = arith.cmpi slt, %268, %c20_i32_83 : i32
    %270 = arith.select %269, %266, %238 : vector<8x128xf32>
    %c8_i32_84 = arith.constant 8 : i32
    %c0_85 = arith.constant 0 : index
    %c0_86 = arith.constant 0 : index
    %271 = vector.load %arg8[%c0_85, %c0_86] : memref<8x128xf32, #tpu.memory_space<vmem>>, vector<8x128xf32>
    tpu.vector_store %arg8[%c0_85, %c0_86], %270 {strides = array<i32>} : memref<8x128xf32, #tpu.memory_space<vmem>>, vector<8x128xf32>,
    %c0_87 = arith.constant 0 : index
    %c0_88 = arith.constant 0 : index
    %272 = vector.load %arg7[%c0_87, %c0_88] : memref<8x128xf32, #tpu.memory_space<vmem>>, vector<8x128xf32>
    tpu.vector_store %arg7[%c0_87, %c0_88], %270 {strides = array<i32>} : memref<8x128xf32, #tpu.memory_space<vmem>>, vector<8x128xf32>,
    return
  }
  func.func @transform_0(%arg0: i32, %arg1: i32) -> (i32, i32, i32) {
    %c0_i32 = arith.constant 0 : i32
    %c0_i32_0 = arith.constant 0 : i32
    return %arg1, %arg0, %c0_i32 : i32, i32, i32
  }
  func.func @transform_1(%arg0: i32, %arg1: i32) -> (i32, i32) {
    %c0_i32 = arith.constant 0 : i32
    %c0_i32_0 = arith.constant 0 : i32
    %c0_i32_1 = arith.constant 0 : i32
    return %c0_i32, %c0_i32_0 : i32, i32
  }
  func.func @transform_2(%arg0: i32, %arg1: i32) -> (i32, i32) {
    %c0_i32 = arith.constant 0 : i32
    %c0_i32_0 = arith.constant 0 : i32
    %c0_i32_1 = arith.constant 0 : i32
    return %c0_i32, %c0_i32_0 : i32, i32
  }
  func.func @transform_3(%arg0: i32, %arg1: i32) -> (i32, i32) {
    %c0_i32 = arith.constant 0 : i32
    %c0_i32_0 = arith.constant 0 : i32
    %c0_i32_1 = arith.constant 0 : i32
    return %c0_i32, %c0_i32_0 : i32, i32
  }
  func.func @transform_4(%arg0: i32, %arg1: i32) -> (i32, i32) {
    %c0_i32 = arith.constant 0 : i32
    %c0_i32_0 = arith.constant 0 : i32
    %c0_i32_1 = arith.constant 0 : i32
    return %c0_i32, %c0_i32_0 : i32, i32
  }
  func.func @transform_5(%arg0: i32, %arg1: i32) -> (i32, i32) {
    %c0_i32 = arith.constant 0 : i32
    %c0_i32_0 = arith.constant 0 : i32
    return %arg0, %c0_i32 : i32, i32
  }
}

</mosaic_0001>

<bundles_post_ra>
// kernel: gru_encoder_forward.1
= control target key start
LH: loop header
LB: loop body
LE: loop exit
PB: predicated region body
PF: predicated region fallthrough
CT: control target
= control target key end

     0   :  { %s2274_s18 = smov 0   ;;  %s2276_s19 = smov 0   ;;  %s2978_s0 = inlined_call_operand.vmem [shape: f32[24,8,4], index: 0, kind: input, shape index: {}]   ;;  %s2979_s1 = inlined_call_operand.vmem [shape: f32[4,384], index: 1, kind: input, shape index: {}]   ;;  %s2980_s2 = inlined_call_operand.vmem [shape: bf16[128,384], index: 2, kind: input, shape index: {}]   ;;  %s2981_s3 = inlined_call_operand.vmem [shape: f32[1,384], index: 3, kind: input, shape index: {}]   ;;  %s2982_s4 = inlined_call_operand.vmem [shape: f32[1,128], index: 4, kind: input, shape index: {}]   ;;  %s2983_s5 = inlined_call_operand.vmem [shape: f32[8,128], index: 5, kind: output, shape index: {}]  }
   0x1   :  { %s2278_s20 = smov 0  }
   0x2 LB: > { %s24_s21 = sadd.s32 1, %s2234_s19  ;;  %p1728_p0 = scmp.ge.s32.totalorder %s2238_s20, 1  ;;  %s2238_s20 = sphi %s2278_s20, %s15_s20   ;;  %s2234_s19 = sphi %s2276_s19, %s2999_s19   ;;  %s2230_s18 = sphi %s2274_s18, %s2998_s18  }
   0x3   : > { %p25_p1 = scmp.ge.s32.totalorder %s24_s21, 3  ;;  %p205_p2 = scmp.lt.s32.totalorder %s2238_s20, 4 }
   0x5   : > { %s3001_s21 = smov (%p25_p1, %s24_s21), 0  ;;  %p206_p3 = pnand %p1728_p0, %p205_p2 }
   0x7   : > { %209 = sbr.rel (%p206_p3) target bundleno = 2155 (0x86b), region = 40 }
   0xe   : > { %s2292_s22 = sshll.u32 %s2230_s18, 3  ;;  %p1731_p5 = scmp.ne.s32.totalorder %s2230_s18, 0 }
   0xf   : > { %p236_p4 = scmp.lt.s32.totalorder %s2292_s22, 23  ;;  %v2240_v0 = vmov (!%p1731_p5), 0.0  }
  0x10   : > { %252 = sbr.rel (%p1731_p5) target bundleno = 23 (0x17), region = 44  ;;  %253 = vst [vmem:[#allocation2] sm:$0xff] (!%p1731_p5), %v2240_v0 }
  0x11   : > { %s237_s23 = scalar_select %p236_p4, %s2292_s22, 23 }
  0x13   : > { %s1730_s24 = sshll.u32 %s237_s23, 3 }
  0x14   : > { %s2299_s27 = scalar_lea.vmem %s2978_s0, %s1730_s24 }
  0x17 PF: > { %v262_v1 = vld [vmem:[%s2979_s1] sm:$0xff]  ;;  %vm309_vm0 = vcmask 1043456   ;;  %vm284_vm1 = vcmask 31744   ;;  %v2986_v4 = vmov 0.0   ;;  %v2321_v7 = vld [vmem:[%s2980_s2 + $0x1c] ss:$12 sps:$4 sm:$0xff]   ;;  %v266_v40 = vlaneseq }
  0x18   : > { %v254_v2 = vld [vmem:[%s2299_s27] sm:$0xff]  ;;  %v283_v3 = vcombine.high %v262_v1, %v262_v1  ;;  %380 = vmatprep.mubr.f32.mxu0 %v2986_v4  ;;  %v255_v8 = vld [vmem:[%s2299_s27 + $0x8] sm:$0xff]  ;;  %v256_v11 = vld [vmem:[%s2299_s27 + $0x10] sm:$0xff]  ;;  %vm2242_vm2 = vmmov 0   ;;  %v2984_v37 = vmov 0   ;;  %p837_p6 = scmp.lt.s32.totalorder %s2292_s22, 20 }
  0x19   : > { %v2309_v5 = vld [vmem:[%s2980_s2 + $0x4] ss:$12 sps:$4 sm:$0xff]   ;;  %1879 = vmatprep.mubr.msk.f32.mxu1 %vm284_vm1, %v254_v2  ;;  %v2315_v6 = vld [vmem:[%s2980_s2] ss:$12 sps:$4 sm:$0xff]   ;;  %v263_v13 = vld [vmem:[%s2979_s1 + $0x8] sm:$0xf] }
  0x1a   : > { %1732 = vmatprep.subr.msk.mxu0 %vm309_vm0, %v283_v3  ;;  %v2332_v9 = vld [vmem:[%s2980_s2 + $0x18] ss:$12 sps:$4 sm:$0xff]   ;;  %v2338_v10 = vld [vmem:[%s2980_s2 + $0x34] ss:$12 sps:$4 sm:$0xff]   ;;  %v2347_v12 = vld [vmem:[%s2980_s2 + $0x30] ss:$12 sps:$4 sm:$0xff]   ;;  %1877 = vmatprep.subr.msk.mxu1 %vm309_vm0, %v263_v13 }
  0x1b   : > { %1733 = vmatpush1.msk.msra.mxu0 %vm309_vm0, %v262_v1  ;;  %v2356_v14 = vld [vmem:[%s2980_s2 + $0x4c] ss:$12 sps:$4 sm:$0xff]   ;;  %1878 = vmatpush3.msk.msra.mxu1 %vm309_vm0, %v263_v13  ;;  %v2365_v15 = vld [vmem:[%s2980_s2 + $0x8] ss:$12 sps:$4 sm:$0xff]   ;;  %v2379_v18 = vld [vmem:[%s2980_s2 + $0x64] ss:$12 sps:$4 sm:$0xff]  }
  0x1c   : > { %1734 = vmatmul.mubr.msk.f32.vlgmr.msra.gmra.mrb[0].mxu0 %vm284_vm1, %v254_v2  ;;  %733 = vmatprep.subr.bf16.mxu0 %v2309_v5  ;;  %v257_v16 = vld [vmem:[%s2299_s27 + $0x18] sm:$0xff]  ;;  %v2373_v17 = vld [vmem:[%s2980_s2 + $0x48] ss:$12 sps:$4 sm:$0xff]   ;;  %v2386_v19 = vld [vmem:[%s2980_s2 + $0x20] ss:$12 sps:$4 sm:$0xff]   ;;  %v267_v41 = vshrl.u32 %v266_v40, 7 }
  0x1d   : > { %734 = vmatpush1.bf16.msra.mxu0 %v2315_v6  ;;  %386 = vmatprep.mubr.f32.mxu0 %v2986_v4  ;;  %v258_v20 = vld [vmem:[%s2299_s27 + $0x20] sm:$0xff]  ;;  %v2403_v22 = vld [vmem:[%s2980_s2 + $0x7c] ss:$12 sps:$4 sm:$0xff]   ;;  %v260_v26 = vld [vmem:[%s2299_s27 + $0x30] sm:$0xff]  ;;  %s838_s18 = scalar_select %p837_p6, 1, 0 }
  0x1e   : > { %735 = vmatprep.subr.bf16.mxu0 %v2321_v7  ;;  %1891 = vmatprep.subr.bf16.mxu1 %v2986_v4  ;;  %v2397_v21 = vld [vmem:[%s2980_s2 + $0x60] ss:$12 sps:$4 sm:$0xff]   ;;  %v2410_v23 = vld [vmem:[%s2980_s2 + $0x38] ss:$12 sps:$4 sm:$0xff]   ;;  %v2435_v28 = vld [vmem:[%s2980_s2 + $0x50] ss:$12 sps:$4 sm:$0xff]  }
  0x1f   : > { %1880 = vmatmul.mubr.msk.f32.vlgmr.msra.gmra.mrb[0].mxu1 %vm284_vm1, %v255_v8  ;;  %v259_v24 = vld [vmem:[%s2299_s27 + $0x28] sm:$0xff]  ;;  %v2421_v25 = vld [vmem:[%s2980_s2 + $0x78] ss:$12 sps:$4 sm:$0xff]   ;;  %v2428_v27 = vld [vmem:[%s2980_s2 + $0x94] ss:$12 sps:$4 sm:$0xff]   ;;  %v268_v42 = vsub.s32 0, %v267_v41 }
  0x20   : > { %1735 = vmatmul.mubr.msk.f32.gmra.mrb[2].mxu0 %vm284_vm1, %v255_v8  ;;  %1892 = vmatpush3.bf16.msra.mxu1 %v2365_v15  ;;  %v2445_v29 = vld [vmem:[%s2980_s2 + $0x90] ss:$12 sps:$4 sm:$0xff]   ;;  %v2452_v31 = vld [vmem:[%s2980_s2 + $0xac] ss:$12 sps:$4 sm:$0xff]   ;;  %v2459_v32 = vld [vmem:[%s2980_s2 + $0x68] ss:$12 sps:$4 sm:$0xff]  }
  0x21   : > { %736 = vmatpush1.bf16.msra.mxu0 %v2332_v9  ;;  %392 = vmatprep.mubr.f32.mxu0 %v2986_v4  ;;  %v261_v30 = vld [vmem:[%s2299_s27 + $0x38] sm:$0xff]  ;;  %v2470_v33 = vld [vmem:[%s2980_s2 + $0xa8] ss:$12 sps:$4 sm:$0xff]   ;;  %v2472_v34 = vld [vmem:[#allocation2] sm:$0xff]  ;;  %v272_v45 = vsub.s32 1, %v267_v41  ;;  %v276_v48 = vsub.s32 2, %v267_v41 }
  0x22   : > { %737 = vmatprep.subr.bf16.mxu0 %v2338_v10  ;;  %1882 = vmatprep.mubr.msk.f32.mxu1 %vm284_vm1, %v256_v11  ;;  %v2479_v35 = vld [vmem:[%s2980_s2 + $0x80] ss:$12 sps:$4 sm:$0xff]   ;;  %v572_v36 = vpack.c.bf16 %v2472_v34, %v2472_v34  ;;  %v2492_v38 = vld [vmem:[%s2980_s2 + $0x98] ss:$12 sps:$4 sm:$0xff]   ;;  %v2502_v39 = vld [vmem:[%s2980_s2 + $0xb0] ss:$12 sps:$4 sm:$0xff]  }
  0x23   : > { %1893 = vmatprep.subr.bf16.mxu1 %v2986_v4  ;;  %1883 = vmatmul.mubr.msk.f32.gmra.mrb[2].mxu1 %vm284_vm1, %v257_v16  ;;  %v264_v43 = vld [vmem:[%s2981_s3] sm:$0x7]  ;;  %s952_s23 = sadd.s32 1, %s2292_s22  ;;  %s1068_s25 = sadd.s32 2, %s2292_s22 }
  0x24   : > { %1736 = vmatmul.mubr.msk.f32.gmra.mrb[4].mxu0 %vm284_vm1, %v256_v11  ;;  %1894 = vmatpush3.bf16.msra.mxu1 %v2386_v19  ;;  %v269_v47 = vrot.slane %v264_v43, %v268_v42  ;;  %v273_v49 = vrot.slane %v264_v43, %v272_v45  ;;  %v2546_v54 = vrot.slane %v264_v43, %v276_v48  ;;  %p953_p7 = scmp.lt.s32.totalorder %s952_s23, 20  ;;  %p1069_p8 = scmp.lt.s32.totalorder %s1068_s25, 20 }
  0x25   : > { %738 = vmatpush1.bf16.msra.mxu0 %v2347_v12  ;;  %398 = vmatprep.mubr.f32.mxu0 %v2986_v4  ;;  %s1184_s28 = sadd.s32 3, %s2292_s22  ;;  %s1300_s27 = sadd.s32 4, %s2292_s22 }
  0x26   : > { %739 = vmatprep.subr.bf16.mxu0 %v2356_v14  ;;  %1885 = vmatprep.mubr.msk.f32.mxu1 %vm284_vm1, %v258_v20  ;;  %s954_s24 = scalar_select %p953_p7, 1, 0 }
  0x27   : > { %1895 = vmatprep.subr.bf16.mxu1 %v2986_v4  ;;  %1886 = vmatmul.mubr.msk.f32.gmra.mrb[4].mxu1 %vm284_vm1, %v259_v24  ;;  %s1070_s26 = scalar_select %p1069_p8, 1, 0 }
  0x28   : > { %1737 = vmatmul.mubr.msk.f32.gmra.mrb[6].mxu0 %vm284_vm1, %v257_v16  ;;  %1896 = vmatpush3.bf16.msra.mxu1 %v2410_v23  ;;  %p1185_p9 = scmp.lt.s32.totalorder %s1184_s28, 20  ;;  %p1301_p10 = scmp.lt.s32.totalorder %s1300_s27, 20 }
  0x29   : > { %740 = vmatpush1.bf16.msra.mxu0 %v2373_v17  ;;  %404 = vmatprep.mubr.f32.mxu0 %v2986_v4  ;;  %s1416_s9 = sadd.s32 5, %s2292_s22  ;;  %s1532_s14 = sadd.s32 6, %s2292_s22 }
  0x2a   : > { %741 = vmatprep.subr.bf16.mxu0 %v2379_v18  ;;  %1888 = vmatprep.mubr.msk.f32.mxu1 %vm284_vm1, %v260_v26  ;;  %s1186_s29 = scalar_select %p1185_p9, 1, 0 }
  0x2b   : > { %1897 = vmatprep.subr.bf16.mxu1 %v2986_v4  ;;  %1889 = vmatmul.mubr.msk.f32.gmra.mrb[6].mxu1 %vm284_vm1, %v261_v30  ;;  %s1302_s7 = scalar_select %p1301_p10, 1, 0 }
  0x2c   : > { %1738 = vmatmul.mubr.msk.f32.gmra.mrb[8].mxu0 %vm284_vm1, %v258_v20  ;;  %1898 = vmatpush3.bf16.msra.mxu1 %v2435_v28  ;;  %p1417_p11 = scmp.lt.s32.totalorder %s1416_s9, 20  ;;  %p1533_p12 = scmp.lt.s32.totalorder %s1532_s14, 20 }
  0x2d   : > { %742 = vmatpush1.bf16.msra.mxu0 %v2397_v21  ;;  %410 = vmatprep.mubr.f32.mxu0 %v2986_v4  ;;  %s1648_s16 = sadd.s32 7, %s2292_s22 }
  0x2e   : > { %743 = vmatprep.subr.bf16.mxu0 %v2403_v22  ;;  %1907 = vmatprep.mubr.msk.bf16.mxu1 %vm2242_vm2, %v2986_v4  ;;  %s1418_s10 = scalar_select %p1417_p11, 1, 0 }
  0x2f   : > { %1899 = vmatprep.subr.bf16.mxu1 %v2986_v4  ;;  %s1534_s15 = scalar_select %p1533_p12, 1, 0 }
  0x30   : > { %1739 = vmatmul.mubr.msk.f32.gmra.mrb[10].mxu0 %vm284_vm1, %v259_v24  ;;  %1900 = vmatpush3.bf16.msra.mxu1 %v2459_v32  ;;  %p1649_p13 = scmp.lt.s32.totalorder %s1648_s16, 20 }
  0x31   : > { %744 = vmatpush1.bf16.msra.mxu0 %v2421_v25  ;;  %416 = vmatprep.mubr.f32.mxu0 %v2986_v4 }
  0x32   : > { %745 = vmatprep.subr.bf16.mxu0 %v2428_v27  ;;  %1901 = vmatprep.subr.bf16.mxu1 %v2986_v4  ;;  %s1650_s17 = scalar_select %p1649_p13, 1, 0 }
  0x34   : > { %1740 = vmatmul.mubr.msk.f32.gmra.mrb[12].mxu0 %vm284_vm1, %v260_v26  ;;  %1902 = vmatpush3.bf16.msra.mxu1 %v2479_v35 }
  0x35   : > { %746 = vmatpush1.bf16.msra.mxu0 %v2445_v29  ;;  %422 = vmatprep.mubr.f32.mxu0 %v2986_v4 }
  0x36   : > { %747 = vmatprep.subr.bf16.mxu0 %v2452_v31  ;;  %1903 = vmatprep.subr.bf16.mxu1 %v2986_v4 }
  0x38   : > { %1741 = vmatmul.mubr.msk.f32.gmra.mrb[14].mxu0 %vm284_vm1, %v261_v30  ;;  %1904 = vmatpush3.bf16.msra.mxu1 %v2492_v38 }
  0x39   : > { %748 = vmatpush1.bf16.msra.mxu0 %v2470_v33  ;;  %765 = vmatprep.mubr.bf16.mxu0 %v2984_v37 }
  0x3a   : > { %849 = vmatprep.subr.bf16.mxu0 %v2309_v5  ;;  %1905 = vmatprep.subr.bf16.mxu1 %v2986_v4 }
  0x3c   : > { %766 = vmatmul.mubr.bf16.vlgmr.msra.gmra.mrb[16].mxu0 %v572_v36  ;;  %1906 = vmatpush3.bf16.msra.mxu1 %v2502_v39 }
  0x3d   : > { %850 = vmatpush1.bf16.msra.mxu0 %v2315_v6  ;;  %881 = vmatprep.mubr.bf16.mxu0 %v2984_v37 }
  0x3e   : > { %851 = vmatprep.subr.bf16.mxu0 %v2321_v7  ;;  %1911 = vmatprep.subr.bf16.mxu1 %v2986_v4 }
  0x3f   : > { %1908 = vmatmul.mubr.bf16.vlgmr.msra.gmra.mrb[8].mxu1 %v572_v36 }
  0x40   : > { %1912 = vmatpush3.bf16.msra.mxu1 %v2365_v15  ;;  %1927 = vmatprep.mubr.msk.bf16.mxu1 %vm2242_vm2, %v2986_v4 }
  0x41   : > { %852 = vmatpush1.bf16.msra.mxu0 %v2332_v9  ;;  %1913 = vmatprep.subr.bf16.mxu1 %v2986_v4 }
  0x42   : > { %853 = vmatprep.subr.bf16.mxu0 %v2338_v10 }
  0x44   : > { %1914 = vmatpush3.bf16.msra.mxu1 %v2386_v19 }
  0x45   : > { %854 = vmatpush1.bf16.msra.mxu0 %v2347_v12  ;;  %1915 = vmatprep.subr.bf16.mxu1 %v2986_v4 }
  0x46   : > { %855 = vmatprep.subr.bf16.mxu0 %v2356_v14 }
  0x48   : > { %1916 = vmatpush3.bf16.msra.mxu1 %v2410_v23 }
  0x49   : > { %856 = vmatpush1.bf16.msra.mxu0 %v2373_v17  ;;  %1917 = vmatprep.subr.bf16.mxu1 %v2986_v4 }
  0x4a   : > { %857 = vmatprep.subr.bf16.mxu0 %v2379_v18 }
  0x4c   : > { %1918 = vmatpush3.bf16.msra.mxu1 %v2435_v28 }
  0x4d   : > { %858 = vmatpush1.bf16.msra.mxu0 %v2397_v21  ;;  %1919 = vmatprep.subr.bf16.mxu1 %v2986_v4 }
  0x4e   : > { %859 = vmatprep.subr.bf16.mxu0 %v2403_v22 }
  0x50   : > { %1920 = vmatpush3.bf16.msra.mxu1 %v2459_v32 }
  0x51   : > { %860 = vmatpush1.bf16.msra.mxu0 %v2421_v25  ;;  %1921 = vmatprep.subr.bf16.mxu1 %v2986_v4 }
  0x52   : > { %861 = vmatprep.subr.bf16.mxu0 %v2428_v27 }
  0x54   : > { %1922 = vmatpush3.bf16.msra.mxu1 %v2479_v35 }
  0x55   : > { %862 = vmatpush1.bf16.msra.mxu0 %v2445_v29  ;;  %1923 = vmatprep.subr.bf16.mxu1 %v2986_v4 }
  0x56   : > { %863 = vmatprep.subr.bf16.mxu0 %v2452_v31 }
  0x58   : > { %1924 = vmatpush3.bf16.msra.mxu1 %v2492_v38 }
  0x59   : > { %864 = vmatpush1.bf16.msra.mxu0 %v2470_v33  ;;  %1925 = vmatprep.subr.bf16.mxu1 %v2986_v4 }
  0x5a   : > { %965 = vmatprep.subr.bf16.mxu0 %v2309_v5 }
  0x5c   : > { %1926 = vmatpush3.bf16.msra.mxu1 %v2502_v39 }
  0x5d   : > { %1931 = vmatprep.subr.bf16.mxu1 %v2986_v4 }
  0xef   : > { %v382_v44 = vpop.f32.mrb[0].mxu0 }
  0xf0   : > { %v384_v46 = vpop.f32.mrb[1].mxu0 }
  0xf2   : > { %v1881_v59 = vpop.f32.mrb[0].mxu1 }
  0xf3   : > { %v388_v50 = vpop.f32.mrb[2].mxu0  ;;  %v2553_v60 = vadd.f32 %v1881_v59, %v2546_v54  ;;  %v495_v61 = vpop.f32.mrb[1].mxu1 }
  0xf4   : > { %v2542_v51 = vadd.f32 %v388_v50, %v269_v47  ;;  %v390_v52 = vpop.f32.mrb[3].mxu0 }
  0xf5   : > { %v2544_v53 = vadd.f32 %v390_v52, %v273_v49 }
  0xf6   : > { %v1884_v2 = vpop.f32.mrb[2].mxu1 }
  0xf7   : > { %v394_v55 = vpop.f32.mrb[4].mxu0  ;;  %v2560_v3 = vadd.f32 %v1884_v2, %v2546_v54  ;;  %v505_v8 = vpop.f32.mrb[3].mxu1 }
  0xf8   : > { %v2548_v56 = vadd.f32 %v394_v55, %v269_v47  ;;  %v396_v57 = vpop.f32.mrb[5].mxu0  ;;  %v2563_v13 = vadd.f32 %v505_v8, %v2546_v54 }
  0xf9   : > { %v2550_v58 = vadd.f32 %v396_v57, %v273_v49 }
  0xfa   : > { %v1887_v26 = vpop.f32.mrb[4].mxu1 }
  0xfb   : > { %v400_v62 = vpop.f32.mrb[6].mxu0  ;;  %v2570_v30 = vadd.f32 %v1887_v26, %v2546_v54  ;;  %v515_v36 = vpop.f32.mrb[5].mxu1  ;;  %v383_v26 = vadd.f32 %v382_v44, %v269_v47 }
  0xfc   : > { %v2555_v63 = vadd.f32 %v400_v62, %v269_v47  ;;  %v402_v0 = vpop.f32.mrb[7].mxu0  ;;  %v2573_v41 = vadd.f32 %v515_v36, %v2546_v54  ;;  %v385_v36 = vadd.f32 %v384_v46, %v273_v49  ;;  %v2596_v46 = vld [vmem:[%s2982_s4] ss:$0 sm:$0xff] }
  0xfd   : > { %v2557_v1 = vadd.f32 %v402_v0, %v273_v49 }
  0xfe   : > { %v1890_v48 = vpop.f32.mrb[6].mxu1 }
  0xff   : > { %v406_v11 = vpop.f32.mrb[8].mxu0  ;;  %v2580_v50 = vadd.f32 %v1890_v48, %v2546_v54  ;;  %v525_v52 = vpop.f32.mrb[7].mxu1 }
 0x100   : > { %v2565_v16 = vadd.f32 %v406_v11, %v269_v47  ;;  %v408_v20 = vpop.f32.mrb[9].mxu0  ;;  %v2583_v57 = vadd.f32 %v525_v52, %v2546_v54 }
 0x101   : > { %v2567_v24 = vadd.f32 %v408_v20, %v273_v49  ;;  %2988 = vst [vmem:[#allocation4_spill] sm:$0xff] %v2580_v50 }
 0x102   : > { %2989 = vst [vmem:[#allocation5_spill] sm:$0xff] %v2583_v57 }
 0x103   : > { %v412_v40 = vpop.f32.mrb[10].mxu0 }
 0x104   : > { %v2575_v42 = vadd.f32 %v412_v40, %v269_v47  ;;  %v414_v43 = vpop.f32.mrb[11].mxu0 }
 0x105   : > { %v2577_v45 = vadd.f32 %v414_v43, %v273_v49 }
 0x107   : > { %v418_v55 = vpop.f32.mrb[12].mxu0 }
 0x108   : > { %v2585_v59 = vadd.f32 %v418_v55, %v269_v47  ;;  %v420_v62 = vpop.f32.mrb[13].mxu0 }
 0x109   : > { %v2587_v0 = vadd.f32 %v420_v62, %v273_v49 }
 0x10b   : > { %2990 = vst [vmem:[#allocation6_spill] sm:$0xff] %v2587_v0  ;;  %v424_v2 = vpop.f32.mrb[14].mxu0 }
 0x10c   : > { %v2589_v8 = vadd.f32 %v424_v2, %v269_v47  ;;  %v426_v11 = vpop.f32.mrb[15].mxu0 }
 0x10d   : > { %v2591_v20 = vadd.f32 %v426_v11, %v273_v49 }
 0x10e   : > { %2991 = vst [vmem:[#allocation7_spill] sm:$0xff] %v2589_v8 }
 0x10f   : > { %v767_v40 = vpop.f32.mrb[16].mxu0 }
 0x110   : > { %v814_v43 = vadd.f32 %v767_v40, %v383_v26  ;;  %v769_v48 = vpop.f32.mrb[17].mxu0 }
 0x111   : > { %v815_v37 = vadd.f32 %v769_v48, %v385_v36  ;;  %v771_v4 = vpop.f32.mrb[18].mxu0  ;;  %v839_v36 = vstv %s838_s18 }
 0x112   : > { %v1776_v52 = vmul.f32 -1.442695, %v814_v43  ;;  %v772_v50 = vpop.f32.mrb[19].mxu0  ;;  %v808_v57 = vpop.f32.mrb[8].mxu1  ;;  %vm840_vm3 = vcmp.eq.s32.totalorder %v839_v36, 1 }
 0x113   : > { %v1777_v55 = vmul.f32 -1.442695, %v815_v37  ;;  %v1909_v62 = vpop.f32.mrb[9].mxu1  ;;  %v828_v47 = vadd.f32 %v2596_v46, %v808_v57  ;;  %v496_v37 = vadd.f32 %v495_v61, %v2546_v54  ;;  %v2992_v61 = vmov 0.0  }
 0x114   : > { %2112 = vpow2.f32 %v1776_v52  ;;  %v811_v2 = vpop.f32.mrb[10].mxu1 }
 0x115   : > { %2114 = vpow2.f32 %v1777_v55  ;;  %v1910_v8 = vpop.f32.mrb[11].mxu1  ;;  %v2993_v55 = vmov 0  }
 0x11e   : > { %v2113_v0 = vpop.eup %2112 }
 0x11f   : > { %v822_v11 = vadd.f32 1.0, %v2113_v0  ;;  %v2115_v44 = vpop.eup %2114 }
 0x120   : > { %v823_v4 = vadd.f32 1.0, %v2115_v44 }
 0x121   : > { %2116 = vrcp.f32 %v822_v11 }
 0x122   : > { %2118 = vrcp.f32 %v823_v4 }
 0x12b   : > { %v2117_v49 = vpop.eup %2116 }
 0x12c   : > { %v829_v50 = vmul.f32 %v2117_v49, %v828_v47  ;;  %v2119_v0 = vpop.eup %2118 }
 0x12d   : > { %v832_v8 = vsub.f32 1.0, %v2119_v0  ;;  %v834_v43 = vmul.f32 %v2119_v0, %v2472_v34 }
 0x12e   : > { %v830_v26 = vadd.f32 %v829_v50, %v496_v37 }
 0x130   : > { %2120 = vtanh.f32 %v830_v26 }
 0x13a   : > { %v2121_v40 = vpop.eup %2120 }
 0x13b   : > { %v833_v48 = vmul.f32 %v2121_v40, %v832_v8 }
 0x13d   : > { %v835_v52 = vadd.f32 %v834_v43, %v833_v48 }
 0x13f   : > { %v2603_v57 = vsel %vm840_vm3, %v835_v52, %v2472_v34 }
 0x140   : > { %v848_v54 = vpack.c.bf16 %v2603_v57, %v2603_v57 }
 0x142   : > { %882 = vmatmul.mubr.bf16.vlgmr.msra.gmra.mrb[20].mxu0 %v848_v54  ;;  %1928 = vmatmul.mubr.bf16.vlgmr.msra.gmra.mrb[12].mxu1 %v848_v54 }
 0x143   : > { %966 = vmatpush1.bf16.msra.mxu0 %v2315_v6  ;;  %1932 = vmatpush3.bf16.msra.mxu1 %v2365_v15 }
 0x144   : > { %967 = vmatprep.subr.bf16.mxu0 %v2321_v7  ;;  %1933 = vmatprep.subr.bf16.mxu1 %v2992_v61 }
 0x145   : > { %997 = vmatprep.mubr.bf16.mxu0 %v2993_v55  ;;  %1947 = vmatprep.mubr.msk.bf16.mxu1 %vm2242_vm2, %v2992_v61 }
 0x147   : > { %968 = vmatpush1.bf16.msra.mxu0 %v2332_v9  ;;  %1934 = vmatpush3.bf16.msra.mxu1 %v2386_v19 }
 0x148   : > { %969 = vmatprep.subr.bf16.mxu0 %v2338_v10  ;;  %1935 = vmatprep.subr.bf16.mxu1 %v2992_v61 }
 0x14b   : > { %970 = vmatpush1.bf16.msra.mxu0 %v2347_v12  ;;  %1936 = vmatpush3.bf16.msra.mxu1 %v2410_v23 }
 0x14c   : > { %971 = vmatprep.subr.bf16.mxu0 %v2356_v14  ;;  %1937 = vmatprep.subr.bf16.mxu1 %v2992_v61 }
 0x14f   : > { %972 = vmatpush1.bf16.msra.mxu0 %v2373_v17  ;;  %1938 = vmatpush3.bf16.msra.mxu1 %v2435_v28 }
 0x150   : > { %973 = vmatprep.subr.bf16.mxu0 %v2379_v18  ;;  %1939 = vmatprep.subr.bf16.mxu1 %v2992_v61 }
 0x153   : > { %974 = vmatpush1.bf16.msra.mxu0 %v2397_v21  ;;  %1940 = vmatpush3.bf16.msra.mxu1 %v2459_v32 }
 0x154   : > { %975 = vmatprep.subr.bf16.mxu0 %v2403_v22  ;;  %1941 = vmatprep.subr.bf16.mxu1 %v2992_v61 }
 0x157   : > { %976 = vmatpush1.bf16.msra.mxu0 %v2421_v25  ;;  %1942 = vmatpush3.bf16.msra.mxu1 %v2479_v35 }
 0x158   : > { %977 = vmatprep.subr.bf16.mxu0 %v2428_v27  ;;  %1943 = vmatprep.subr.bf16.mxu1 %v2992_v61 }
 0x15b   : > { %978 = vmatpush1.bf16.msra.mxu0 %v2445_v29  ;;  %1944 = vmatpush3.bf16.msra.mxu1 %v2492_v38 }
 0x15c   : > { %979 = vmatprep.subr.bf16.mxu0 %v2452_v31  ;;  %1945 = vmatprep.subr.bf16.mxu1 %v2992_v61 }
 0x15f   : > { %980 = vmatpush1.bf16.msra.mxu0 %v2470_v33  ;;  %1946 = vmatpush3.bf16.msra.mxu1 %v2502_v39 }
 0x160   : > { %1081 = vmatprep.subr.bf16.mxu0 %v2309_v5  ;;  %1951 = vmatprep.subr.bf16.mxu1 %v2992_v61 }
 0x215   : > { %v883_v34 = vpop.f32.mrb[20].mxu0  ;;  %v924_v62 = vpop.f32.mrb[12].mxu1 }
 0x216   : > { %v930_v2 = vadd.f32 %v883_v34, %v2542_v51  ;;  %v885_v11 = vpop.f32.mrb[21].mxu0  ;;  %v1929_v44 = vpop.f32.mrb[13].mxu1  ;;  %v944_v51 = vadd.f32 %v2596_v46, %v924_v62 }
 0x217   : > { %v931_v4 = vadd.f32 %v885_v11, %v2544_v53  ;;  %v887_v47 = vpop.f32.mrb[22].mxu0  ;;  %v927_v49 = vpop.f32.mrb[14].mxu1 }
 0x218   : > { %v1779_v37 = vmul.f32 -1.442695, %v930_v2  ;;  %v888_v50 = vpop.f32.mrb[23].mxu0  ;;  %v1930_v26 = vpop.f32.mrb[15].mxu1  ;;  %v955_v2 = vstv %s954_s24 }
 0x219   : > { %v1780_v0 = vmul.f32 -1.442695, %v931_v4  ;;  %vm956_vm4 = vcmp.eq.s32.totalorder %v955_v2, 1 }
 0x21a   : > { %2122 = vpow2.f32 %v1779_v37 }
 0x21b   : > { %2124 = vpow2.f32 %v1780_v0 }
 0x224   : > { %v2123_v8 = vpop.eup %2122 }
 0x225   : > { %v938_v36 = vadd.f32 1.0, %v2123_v8  ;;  %v2125_v40 = vpop.eup %2124 }
 0x226   : > { %v939_v43 = vadd.f32 1.0, %v2125_v40 }
 0x227   : > { %2126 = vrcp.f32 %v938_v36 }
 0x228   : > { %2128 = vrcp.f32 %v939_v43 }
 0x231   : > { %v2127_v48 = vpop.eup %2126 }
 0x232   : > { %v945_v52 = vmul.f32 %v2127_v48, %v944_v51  ;;  %v2129_v54 = vpop.eup %2128 }
 0x233   : > { %v948_v34 = vsub.f32 1.0, %v2129_v54  ;;  %v950_v44 = vmul.f32 %v2129_v54, %v2603_v57 }
 0x234   : > { %v946_v53 = vadd.f32 %v945_v52, %v2553_v60 }
 0x236   : > { %2130 = vtanh.f32 %v946_v53 }
 0x240   : > { %v2131_v11 = vpop.eup %2130 }
 0x241   : > { %v949_v4 = vmul.f32 %v2131_v11, %v948_v34 }
 0x243   : > { %v951_v47 = vadd.f32 %v950_v44, %v949_v4 }
 0x245   : > { %v2649_v62 = vsel %vm956_vm4, %v951_v47, %v2603_v57  ;;  %v1071_v47 = vstv %s1070_s26 }
 0x246   : > { %v964_v49 = vpack.c.bf16 %v2649_v62, %v2649_v62  ;;  %vm1072_vm5 = vcmp.eq.s32.totalorder %v1071_v47, 1  ;;  %v1187_v47 = vstv %s1186_s29 }
 0x247   : > { %vm1188_vm6 = vcmp.eq.s32.totalorder %v1187_v47, 1  ;;  %v2847_v47 = vld [vmem:[%s2980_s2 + $0x4c] ss:$12 sps:$4 sm:$0xff]  }
 0x248   : > { %998 = vmatmul.mubr.bf16.vlgmr.msra.gmra.mrb[24].mxu0 %v964_v49  ;;  %1948 = vmatmul.mubr.bf16.vlgmr.msra.gmra.mrb[16].mxu1 %v964_v49 }
 0x249   : > { %1082 = vmatpush1.bf16.msra.mxu0 %v2315_v6  ;;  %1952 = vmatpush3.bf16.msra.mxu1 %v2365_v15 }
 0x24a   : > { %1083 = vmatprep.subr.bf16.mxu0 %v2321_v7  ;;  %1953 = vmatprep.subr.bf16.mxu1 %v2992_v61 }
 0x24b   : > { %1113 = vmatprep.mubr.bf16.mxu0 %v2993_v55  ;;  %1967 = vmatprep.mubr.msk.bf16.mxu1 %vm2242_vm2, %v2992_v61 }
 0x24d   : > { %1084 = vmatpush1.bf16.msra.mxu0 %v2332_v9  ;;  %1954 = vmatpush3.bf16.msra.mxu1 %v2386_v19 }
 0x24e   : > { %1085 = vmatprep.subr.bf16.mxu0 %v2338_v10  ;;  %1955 = vmatprep.subr.bf16.mxu1 %v2992_v61 }
 0x251   : > { %1086 = vmatpush1.bf16.msra.mxu0 %v2347_v12  ;;  %1956 = vmatpush3.bf16.msra.mxu1 %v2410_v23 }
 0x252   : > { %1087 = vmatprep.subr.bf16.mxu0 %v2356_v14  ;;  %1957 = vmatprep.subr.bf16.mxu1 %v2992_v61 }
 0x255   : > { %1088 = vmatpush1.bf16.msra.mxu0 %v2373_v17  ;;  %1958 = vmatpush3.bf16.msra.mxu1 %v2435_v28 }
 0x256   : > { %1089 = vmatprep.subr.bf16.mxu0 %v2379_v18  ;;  %1959 = vmatprep.subr.bf16.mxu1 %v2992_v61 }
 0x259   : > { %1090 = vmatpush1.bf16.msra.mxu0 %v2397_v21  ;;  %1960 = vmatpush3.bf16.msra.mxu1 %v2459_v32 }
 0x25a   : > { %1091 = vmatprep.subr.bf16.mxu0 %v2403_v22  ;;  %1961 = vmatprep.subr.bf16.mxu1 %v2992_v61 }
 0x25d   : > { %1092 = vmatpush1.bf16.msra.mxu0 %v2421_v25  ;;  %1962 = vmatpush3.bf16.msra.mxu1 %v2479_v35 }
 0x25e   : > { %1093 = vmatprep.subr.bf16.mxu0 %v2428_v27  ;;  %1963 = vmatprep.subr.bf16.mxu1 %v2992_v61 }
 0x261   : > { %1094 = vmatpush1.bf16.msra.mxu0 %v2445_v29  ;;  %1964 = vmatpush3.bf16.msra.mxu1 %v2492_v38 }
 0x262   : > { %1095 = vmatprep.subr.bf16.mxu0 %v2452_v31  ;;  %1965 = vmatprep.subr.bf16.mxu1 %v2992_v61 }
 0x265   : > { %1096 = vmatpush1.bf16.msra.mxu0 %v2470_v33  ;;  %1966 = vmatpush3.bf16.msra.mxu1 %v2502_v39 }
 0x266   : > { %1197 = vmatprep.subr.bf16.mxu0 %v2309_v5  ;;  %1971 = vmatprep.subr.bf16.mxu1 %v2992_v61 }
 0x31b   : > { %v999_v60 = vpop.f32.mrb[24].mxu0  ;;  %v1040_v57 = vpop.f32.mrb[16].mxu1 }
 0x31c   : > { %v1046_v37 = vadd.f32 %v999_v60, %v2548_v56  ;;  %v1001_v50 = vpop.f32.mrb[25].mxu0  ;;  %v1949_v26 = vpop.f32.mrb[17].mxu1  ;;  %v1060_v56 = vadd.f32 %v2596_v46, %v1040_v57 }
 0x31d   : > { %v1047_v0 = vadd.f32 %v1001_v50, %v2550_v58  ;;  %v1003_v8 = vpop.f32.mrb[26].mxu0  ;;  %v1043_v36 = vpop.f32.mrb[18].mxu1 }
 0x31e   : > { %v1781_v40 = vmul.f32 -1.442695, %v1046_v37  ;;  %v1004_v43 = vpop.f32.mrb[27].mxu0  ;;  %v1950_v51 = vpop.f32.mrb[19].mxu1 }
 0x31f   : > { %v1782_v48 = vmul.f32 -1.442695, %v1047_v0 }
 0x320   : > { %2132 = vpow2.f32 %v1781_v40 }
 0x321   : > { %2134 = vpow2.f32 %v1782_v48 }
 0x32a   : > { %v2133_v52 = vpop.eup %2132 }
 0x32b   : > { %v1054_v53 = vadd.f32 1.0, %v2133_v52  ;;  %v2135_v54 = vpop.eup %2134 }
 0x32c   : > { %v1055_v34 = vadd.f32 1.0, %v2135_v54 }
 0x32d   : > { %2136 = vrcp.f32 %v1054_v53 }
 0x32e   : > { %2138 = vrcp.f32 %v1055_v34 }
 0x337   : > { %v2137_v2 = vpop.eup %2136 }
 0x338   : > { %v1061_v11 = vmul.f32 %v2137_v2, %v1060_v56  ;;  %v2139_v44 = vpop.eup %2138 }
 0x339   : > { %v1064_v4 = vsub.f32 1.0, %v2139_v44  ;;  %v1066_v60 = vmul.f32 %v2139_v44, %v2649_v62 }
 0x33a   : > { %v1062_v58 = vadd.f32 %v1061_v11, %v2563_v13 }
 0x33c   : > { %2140 = vtanh.f32 %v1062_v58 }
 0x346   : > { %v2141_v49 = vpop.eup %2140 }
 0x347   : > { %v1065_v37 = vmul.f32 %v2141_v49, %v1064_v4 }
 0x349   : > { %v1067_v50 = vadd.f32 %v1066_v60, %v1065_v37 }
 0x34b   : > { %v2695_v57 = vsel %vm1072_vm5, %v1067_v50, %v2649_v62 }
 0x34c   : > { %v1080_v26 = vpack.c.bf16 %v2695_v57, %v2695_v57 }
 0x34e   : > { %1114 = vmatmul.mubr.bf16.vlgmr.msra.gmra.mrb[28].mxu0 %v1080_v26  ;;  %1968 = vmatmul.mubr.bf16.vlgmr.msra.gmra.mrb[20].mxu1 %v1080_v26 }
 0x34f   : > { %1198 = vmatpush1.bf16.msra.mxu0 %v2315_v6  ;;  %1972 = vmatpush3.bf16.msra.mxu1 %v2365_v15 }
 0x350   : > { %1199 = vmatprep.subr.bf16.mxu0 %v2321_v7  ;;  %1973 = vmatprep.subr.bf16.mxu1 %v2992_v61 }
 0x351   : > { %1229 = vmatprep.mubr.bf16.mxu0 %v2993_v55  ;;  %1987 = vmatprep.mubr.msk.bf16.mxu1 %vm2242_vm2, %v2992_v61 }
 0x353   : > { %1200 = vmatpush1.bf16.msra.mxu0 %v2332_v9  ;;  %1974 = vmatpush3.bf16.msra.mxu1 %v2386_v19 }
 0x354   : > { %1201 = vmatprep.subr.bf16.mxu0 %v2338_v10  ;;  %1975 = vmatprep.subr.bf16.mxu1 %v2992_v61 }
 0x357   : > { %1202 = vmatpush1.bf16.msra.mxu0 %v2347_v12  ;;  %1976 = vmatpush3.bf16.msra.mxu1 %v2410_v23 }
 0x358   : > { %1203 = vmatprep.subr.bf16.mxu0 %v2356_v14  ;;  %1977 = vmatprep.subr.bf16.mxu1 %v2992_v61 }
 0x35b   : > { %1204 = vmatpush1.bf16.msra.mxu0 %v2373_v17  ;;  %1978 = vmatpush3.bf16.msra.mxu1 %v2435_v28 }
 0x35c   : > { %1205 = vmatprep.subr.bf16.mxu0 %v2379_v18  ;;  %1979 = vmatprep.subr.bf16.mxu1 %v2992_v61 }
 0x35f   : > { %1206 = vmatpush1.bf16.msra.mxu0 %v2397_v21  ;;  %1980 = vmatpush3.bf16.msra.mxu1 %v2459_v32 }
 0x360   : > { %1207 = vmatprep.subr.bf16.mxu0 %v2403_v22  ;;  %1981 = vmatprep.subr.bf16.mxu1 %v2992_v61 }
 0x363   : > { %1208 = vmatpush1.bf16.msra.mxu0 %v2421_v25  ;;  %1982 = vmatpush3.bf16.msra.mxu1 %v2479_v35 }
 0x364   : > { %1209 = vmatprep.subr.bf16.mxu0 %v2428_v27  ;;  %1983 = vmatprep.subr.bf16.mxu1 %v2992_v61 }
 0x367   : > { %1210 = vmatpush1.bf16.msra.mxu0 %v2445_v29  ;;  %1984 = vmatpush3.bf16.msra.mxu1 %v2492_v38 }
 0x368   : > { %1211 = vmatprep.subr.bf16.mxu0 %v2452_v31  ;;  %1985 = vmatprep.subr.bf16.mxu1 %v2992_v61 }
 0x36b   : > { %1212 = vmatpush1.bf16.msra.mxu0 %v2470_v33  ;;  %1986 = vmatpush3.bf16.msra.mxu1 %v2502_v39 }
 0x36c   : > { %1313 = vmatprep.subr.bf16.mxu0 %v2309_v5  ;;  %1991 = vmatprep.subr.bf16.mxu1 %v2992_v61 }
 0x421   : > { %v1115_v13 = vpop.f32.mrb[28].mxu0  ;;  %v1156_v62 = vpop.f32.mrb[20].mxu1 }
 0x422   : > { %v1162_v0 = vadd.f32 %v1115_v13, %v2555_v63  ;;  %v1117_v8 = vpop.f32.mrb[29].mxu0  ;;  %v1969_v36 = vpop.f32.mrb[21].mxu1  ;;  %v1176_v63 = vadd.f32 %v2596_v46, %v1156_v62 }
 0x423   : > { %v1163_v40 = vadd.f32 %v1117_v8, %v2557_v1  ;;  %v1119_v43 = vpop.f32.mrb[30].mxu0  ;;  %v1159_v51 = vpop.f32.mrb[22].mxu1 }
 0x424   : > { %v1783_v48 = vmul.f32 -1.442695, %v1162_v0  ;;  %v1120_v52 = vpop.f32.mrb[31].mxu0  ;;  %v1970_v53 = vpop.f32.mrb[23].mxu1 }
 0x425   : > { %v1784_v54 = vmul.f32 -1.442695, %v1163_v40  ;;  %v1303_v52 = vstv %s1302_s7 }
 0x426   : > { %2142 = vpow2.f32 %v1783_v48  ;;  %vm1304_vm7 = vcmp.eq.s32.totalorder %v1303_v52, 1 }
 0x427   : > { %2144 = vpow2.f32 %v1784_v54 }
 0x430   : > { %v2143_v5 = vpop.eup %2142 }
 0x431   : > { %v1170_v34 = vadd.f32 1.0, %v2143_v5  ;;  %v2145_v56 = vpop.eup %2144 }
 0x432   : > { %v1171_v2 = vadd.f32 1.0, %v2145_v56 }
 0x433   : > { %2146 = vrcp.f32 %v1170_v34 }
 0x434   : > { %2148 = vrcp.f32 %v1171_v2 }
 0x43d   : > { %v2147_v11 = vpop.eup %2146 }
 0x43e   : > { %v1177_v58 = vmul.f32 %v2147_v11, %v1176_v63  ;;  %v2149_v44 = vpop.eup %2148  ;;  %v2805_v63 = vld [vmem:[%s2980_s2 + $0x8] ss:$12 sps:$4 sm:$0xff]  }
 0x43f   : > { %v1180_v4 = vsub.f32 1.0, %v2149_v44  ;;  %v1182_v60 = vmul.f32 %v2149_v44, %v2695_v57  ;;  %v2811_v11 = vld [vmem:[%s2980_s2 + $0x1c] ss:$12 sps:$4 sm:$0xff]   ;;  %v2833_v44 = vld [vmem:[%s2980_s2 + $0x34] ss:$12 sps:$4 sm:$0xff]  }
 0x440   : > { %v1178_v1 = vadd.f32 %v1177_v58, %v2560_v3  ;;  %v2821_v58 = vld [vmem:[%s2980_s2 + $0x18] ss:$12 sps:$4 sm:$0xff]  }
 0x442   : > { %2150 = vtanh.f32 %v1178_v1  ;;  %v2827_v1 = vld [vmem:[%s2980_s2 + $0x20] ss:$12 sps:$4 sm:$0xff]  }
 0x44c   : > { %v2151_v49 = vpop.eup %2150 }
 0x44d   : > { %v1181_v37 = vmul.f32 %v2151_v49, %v1180_v4  ;;  %v2840_v4 = vld [vmem:[%s2980_s2 + $0x30] ss:$12 sps:$4 sm:$0xff]   ;;  %v2854_v49 = vld [vmem:[%s2980_s2 + $0x48] ss:$12 sps:$4 sm:$0xff]  }
 0x44f   : > { %v1183_v50 = vadd.f32 %v1182_v60, %v1181_v37  ;;  %v2868_v60 = vld [vmem:[%s2980_s2 + $0x60] ss:$12 sps:$4 sm:$0xff]  }
 0x451   : > { %v2741_v26 = vsel %vm1188_vm6, %v1183_v50, %v2695_v57 }
 0x452   : > { %v1196_v13 = vpack.c.bf16 %v2741_v26, %v2741_v26 }
 0x454   : > { %1230 = vmatmul.mubr.bf16.vlgmr.msra.gmra.mrb[32].mxu0 %v1196_v13  ;;  %1988 = vmatmul.mubr.bf16.vlgmr.msra.gmra.mrb[24].mxu1 %v1196_v13 }
 0x455   : > { %1314 = vmatpush1.bf16.msra.mxu0 %v2315_v6  ;;  %1992 = vmatpush3.bf16.msra.mxu1 %v2365_v15  ;;  %v2781_v6 = vld [vmem:[%s2980_s2 + $0x4] ss:$12 sps:$4 sm:$0xff]  }
 0x456   : > { %1315 = vmatprep.subr.bf16.mxu0 %v2321_v7  ;;  %1993 = vmatprep.subr.bf16.mxu1 %v2992_v61 }
 0x457   : > { %1345 = vmatprep.mubr.bf16.mxu0 %v2993_v55  ;;  %2007 = vmatprep.mubr.msk.bf16.mxu1 %vm2242_vm2, %v2992_v61 }
 0x459   : > { %1316 = vmatpush1.bf16.msra.mxu0 %v2332_v9  ;;  %1994 = vmatpush3.bf16.msra.mxu1 %v2386_v19 }
 0x45a   : > { %1317 = vmatprep.subr.bf16.mxu0 %v2338_v10  ;;  %1995 = vmatprep.subr.bf16.mxu1 %v2992_v61 }
 0x45d   : > { %1318 = vmatpush1.bf16.msra.mxu0 %v2347_v12  ;;  %1996 = vmatpush3.bf16.msra.mxu1 %v2410_v23 }
 0x45e   : > { %1319 = vmatprep.subr.bf16.mxu0 %v2356_v14  ;;  %1997 = vmatprep.subr.bf16.mxu1 %v2992_v61 }
 0x461   : > { %1320 = vmatpush1.bf16.msra.mxu0 %v2373_v17  ;;  %1998 = vmatpush3.bf16.msra.mxu1 %v2435_v28 }
 0x462   : > { %1321 = vmatprep.subr.bf16.mxu0 %v2379_v18  ;;  %1999 = vmatprep.subr.bf16.mxu1 %v2992_v61 }
 0x465   : > { %1322 = vmatpush1.bf16.msra.mxu0 %v2397_v21  ;;  %2000 = vmatpush3.bf16.msra.mxu1 %v2459_v32 }
 0x466   : > { %1323 = vmatprep.subr.bf16.mxu0 %v2403_v22  ;;  %2001 = vmatprep.subr.bf16.mxu1 %v2992_v61 }
 0x469   : > { %1324 = vmatpush1.bf16.msra.mxu0 %v2421_v25  ;;  %2002 = vmatpush3.bf16.msra.mxu1 %v2479_v35 }
 0x46a   : > { %1325 = vmatprep.subr.bf16.mxu0 %v2428_v27  ;;  %2003 = vmatprep.subr.bf16.mxu1 %v2992_v61 }
 0x46d   : > { %1326 = vmatpush1.bf16.msra.mxu0 %v2445_v29  ;;  %2004 = vmatpush3.bf16.msra.mxu1 %v2492_v38 }
 0x46e   : > { %1327 = vmatprep.subr.bf16.mxu0 %v2452_v31  ;;  %2005 = vmatprep.subr.bf16.mxu1 %v2992_v61 }
 0x471   : > { %1328 = vmatpush1.bf16.msra.mxu0 %v2470_v33  ;;  %2006 = vmatpush3.bf16.msra.mxu1 %v2502_v39 }
 0x472   : > { %1429 = vmatprep.subr.bf16.mxu0 %v2781_v6  ;;  %2011 = vmatprep.subr.bf16.mxu1 %v2992_v61 }
 0x527   : > { %v1231_v7 = vpop.f32.mrb[32].mxu0  ;;  %v1272_v9 = vpop.f32.mrb[24].mxu1 }
 0x528   : > { %v1278_v10 = vadd.f32 %v1231_v7, %v2565_v16  ;;  %v1233_v12 = vpop.f32.mrb[33].mxu0  ;;  %v1989_v14 = vpop.f32.mrb[25].mxu1  ;;  %v1292_v16 = vadd.f32 %v2596_v46, %v1272_v9 }
 0x529   : > { %v1279_v15 = vadd.f32 %v1233_v12, %v2567_v24  ;;  %v1235_v17 = vpop.f32.mrb[34].mxu0  ;;  %v1275_v18 = vpop.f32.mrb[26].mxu1  ;;  %v1419_v14 = vstv %s1418_s10 }
 0x52a   : > { %v1785_v19 = vmul.f32 -1.442695, %v1278_v10  ;;  %v1236_v21 = vpop.f32.mrb[35].mxu0  ;;  %v1990_v3 = vpop.f32.mrb[27].mxu1  ;;  %vm1420_vm8 = vcmp.eq.s32.totalorder %v1419_v14, 1 }
 0x52b   : > { %v1786_v57 = vmul.f32 -1.442695, %v1279_v15 }
 0x52c   : > { %2152 = vpow2.f32 %v1785_v19 }
 0x52d   : > { %2154 = vpow2.f32 %v1786_v57  ;;  %v2206_v57 = vld [vmem:[%s2980_s2 + $0x68] ss:$12 sps:$4 sm:$0xff]  }
 0x536   : > { %v2153_v62 = vpop.eup %2152 }
 0x537   : > { %v1286_v0 = vadd.f32 1.0, %v2153_v62  ;;  %v2155_v8 = vpop.eup %2154  ;;  %v2207_v62 = vld [vmem:[%s2980_s2 + $0x7c] ss:$12 sps:$4 sm:$0xff]  }
 0x538   : > { %v1287_v36 = vadd.f32 1.0, %v2155_v8  ;;  %v2209_v8 = vld [vmem:[%s2980_s2 + $0x80] ss:$12 sps:$4 sm:$0xff]  }
 0x539   : > { %2156 = vrcp.f32 %v1286_v0  ;;  %v2208_v0 = vld [vmem:[%s2980_s2 + $0x78] ss:$12 sps:$4 sm:$0xff]  }
 0x53a   : > { %2158 = vrcp.f32 %v1287_v36  ;;  %v2210_v36 = vld [vmem:[%s2980_s2 + $0x94] ss:$12 sps:$4 sm:$0xff]  }
 0x543   : > { %v2157_v40 = vpop.eup %2156 }
 0x544   : > { %v1293_v43 = vmul.f32 %v2157_v40, %v1292_v16  ;;  %v2159_v51 = vpop.eup %2158  ;;  %v2211_v16 = vld [vmem:[%s2980_s2 + $0x90] ss:$12 sps:$4 sm:$0xff]   ;;  %v2212_v40 = vld [vmem:[%s2980_s2 + $0x98] ss:$12 sps:$4 sm:$0xff]  }
 0x545   : > { %v1296_v48 = vsub.f32 1.0, %v2159_v51  ;;  %v1298_v54 = vmul.f32 %v2159_v51, %v2741_v26  ;;  %v2215_v51 = vld [vmem:[%s2980_s2 + $0xb0] ss:$12 sps:$4 sm:$0xff]  }
 0x546   : > { %v1294_v24 = vadd.f32 %v1293_v43, %v2573_v41  ;;  %v2799_v41 = vld [vmem:[%s2980_s2] ss:$12 sps:$4 sm:$0xff]  }
 0x547   : > { %v2213_v43 = vld [vmem:[%s2980_s2 + $0xac] ss:$12 sps:$4 sm:$0xff]  }
 0x548   : > { %2160 = vtanh.f32 %v1294_v24  ;;  %v2214_v24 = vld [vmem:[%s2980_s2 + $0xa8] ss:$12 sps:$4 sm:$0xff]  }
 0x552   : > { %v2161_v53 = vpop.eup %2160 }
 0x553   : > { %v1297_v5 = vmul.f32 %v2161_v53, %v1296_v48 }
 0x555   : > { %v1299_v34 = vadd.f32 %v1298_v54, %v1297_v5 }
 0x557   : > { %v2792_v56 = vsel %vm1304_vm7, %v1299_v34, %v2741_v26  ;;  %v2994_v34 = vld [vmem:[#allocation6_spill] sm:$0xff] }
 0x558   : > { %v1312_v2 = vpack.c.bf16 %v2792_v56, %v2792_v56 }
 0x55a   : > { %1346 = vmatmul.mubr.bf16.vlgmr.msra.gmra.mrb[36].mxu0 %v1312_v2  ;;  %2008 = vmatmul.mubr.bf16.vlgmr.msra.gmra.mrb[28].mxu1 %v1312_v2 }
 0x55b   : > { %1430 = vmatpush1.bf16.msra.mxu0 %v2799_v41  ;;  %2012 = vmatpush3.bf16.msra.mxu1 %v2805_v63 }
 0x55c   : > { %1431 = vmatprep.subr.bf16.mxu0 %v2811_v11  ;;  %2013 = vmatprep.subr.bf16.mxu1 %v2992_v61 }
 0x55d   : > { %1461 = vmatprep.mubr.bf16.mxu0 %v2993_v55  ;;  %2027 = vmatprep.mubr.msk.bf16.mxu1 %vm2242_vm2, %v2992_v61 }
 0x55f   : > { %1432 = vmatpush1.bf16.msra.mxu0 %v2821_v58  ;;  %2014 = vmatpush3.bf16.msra.mxu1 %v2827_v1 }
 0x560   : > { %1433 = vmatprep.subr.bf16.mxu0 %v2833_v44  ;;  %2015 = vmatprep.subr.bf16.mxu1 %v2992_v61 }
 0x563   : > { %1434 = vmatpush1.bf16.msra.mxu0 %v2840_v4  ;;  %2016 = vmatpush3.bf16.msra.mxu1 %v2410_v23  ;;  %v2861_v23 = vld [vmem:[%s2980_s2 + $0x64] ss:$12 sps:$4 sm:$0xff]  }
 0x564   : > { %1435 = vmatprep.subr.bf16.mxu0 %v2847_v47  ;;  %2017 = vmatprep.subr.bf16.mxu1 %v2992_v61 }
 0x567   : > { %1436 = vmatpush1.bf16.msra.mxu0 %v2854_v49  ;;  %2018 = vmatpush3.bf16.msra.mxu1 %v2435_v28 }
 0x568   : > { %1437 = vmatprep.subr.bf16.mxu0 %v2861_v23  ;;  %2019 = vmatprep.subr.bf16.mxu1 %v2992_v61 }
 0x56b   : > { %1438 = vmatpush1.bf16.msra.mxu0 %v2868_v60  ;;  %2020 = vmatpush3.bf16.msra.mxu1 %v2459_v32 }
 0x56c   : > { %1439 = vmatprep.subr.bf16.mxu0 %v2403_v22  ;;  %2021 = vmatprep.subr.bf16.mxu1 %v2992_v61 }
 0x56f   : > { %1440 = vmatpush1.bf16.msra.mxu0 %v2421_v25  ;;  %2022 = vmatpush3.bf16.msra.mxu1 %v2479_v35 }
 0x570   : > { %1441 = vmatprep.subr.bf16.mxu0 %v2428_v27  ;;  %2023 = vmatprep.subr.bf16.mxu1 %v2992_v61 }
 0x573   : > { %1442 = vmatpush1.bf16.msra.mxu0 %v2445_v29  ;;  %2024 = vmatpush3.bf16.msra.mxu1 %v2492_v38 }
 0x574   : > { %1443 = vmatprep.subr.bf16.mxu0 %v2452_v31  ;;  %2025 = vmatprep.subr.bf16.mxu1 %v2992_v61 }
 0x577   : > { %1444 = vmatpush1.bf16.msra.mxu0 %v2470_v33  ;;  %2026 = vmatpush3.bf16.msra.mxu1 %v2502_v39 }
 0x578   : > { %1545 = vmatprep.subr.bf16.mxu0 %v2781_v6  ;;  %2031 = vmatprep.subr.bf16.mxu1 %v2992_v61 }
 0x62d   : > { %v1347_v22 = vpop.f32.mrb[36].mxu0  ;;  %v1388_v25 = vpop.f32.mrb[28].mxu1 }
 0x62e   : > { %v1394_v27 = vadd.f32 %v1347_v22, %v2575_v42  ;;  %v1349_v28 = vpop.f32.mrb[37].mxu0  ;;  %v2009_v29 = vpop.f32.mrb[29].mxu1  ;;  %v1408_v42 = vadd.f32 %v2596_v46, %v1388_v25 }
 0x62f   : > { %v1395_v32 = vadd.f32 %v1349_v28, %v2577_v45  ;;  %v1351_v35 = vpop.f32.mrb[38].mxu0  ;;  %v1391_v31 = vpop.f32.mrb[30].mxu1  ;;  %v1535_v28 = vstv %s1534_s15 }
 0x630   : > { %v1787_v38 = vmul.f32 -1.442695, %v1394_v27  ;;  %v1352_v37 = vpop.f32.mrb[39].mxu0  ;;  %v2010_v33 = vpop.f32.mrb[31].mxu1  ;;  %vm1536_vm9 = vcmp.eq.s32.totalorder %v1535_v28, 1 }
 0x631   : > { %v1788_v39 = vmul.f32 -1.442695, %v1395_v32 }
 0x632   : > { %2162 = vpow2.f32 %v1787_v38 }
 0x633   : > { %2164 = vpow2.f32 %v1788_v39 }
 0x63c   : > { %v2163_v50 = vpop.eup %2162 }
 0x63d   : > { %v1402_v26 = vadd.f32 1.0, %v2163_v50  ;;  %v2165_v13 = vpop.eup %2164  ;;  %v2996_v50 = vld [vmem:[#allocation7_spill] sm:$0xff] }
 0x63e   : > { %v1403_v6 = vadd.f32 1.0, %v2165_v13 }
 0x63f   : > { %2166 = vrcp.f32 %v1402_v26 }
 0x640   : > { %2168 = vrcp.f32 %v1403_v6 }
 0x649   : > { %v2167_v7 = vpop.eup %2166 }
 0x64a   : > { %v1409_v9 = vmul.f32 %v2167_v7, %v1408_v42  ;;  %v2169_v10 = vpop.eup %2168 }
 0x64b   : > { %v1412_v12 = vsub.f32 1.0, %v2169_v10  ;;  %v1414_v17 = vmul.f32 %v2169_v10, %v2792_v56 }
 0x64c   : > { %v1410_v45 = vadd.f32 %v1409_v9, %v2570_v30  ;;  %v2204_v30 = vld [vmem:[%s2980_s2 + $0x38] ss:$12 sps:$4 sm:$0xff]  }
 0x64e   : > { %2170 = vtanh.f32 %v1410_v45 }
 0x658   : > { %v2171_v15 = vpop.eup %2170 }
 0x659   : > { %v1413_v18 = vmul.f32 %v2171_v15, %v1412_v12 }
 0x65b   : > { %v1415_v19 = vadd.f32 %v1414_v17, %v1413_v18 }
 0x65d   : > { %v2893_v21 = vsel %vm1420_vm8, %v1415_v19, %v2792_v56 }
 0x65e   : > { %v1428_v3 = vpack.c.bf16 %v2893_v21, %v2893_v21 }
 0x660   : > { %1462 = vmatmul.mubr.bf16.vlgmr.msra.gmra.mrb[40].mxu0 %v1428_v3  ;;  %2028 = vmatmul.mubr.bf16.vlgmr.msra.gmra.mrb[32].mxu1 %v1428_v3 }
 0x661   : > { %1546 = vmatpush1.bf16.msra.mxu0 %v2799_v41  ;;  %2032 = vmatpush3.bf16.msra.mxu1 %v2805_v63 }
 0x662   : > { %1547 = vmatprep.subr.bf16.mxu0 %v2811_v11  ;;  %2033 = vmatprep.subr.bf16.mxu1 %v2992_v61 }
 0x663   : > { %1577 = vmatprep.mubr.bf16.mxu0 %v2993_v55  ;;  %2047 = vmatprep.mubr.msk.bf16.mxu1 %vm2242_vm2, %v2992_v61  ;;  %v2205_v55 = vld [vmem:[%s2980_s2 + $0x50] ss:$12 sps:$4 sm:$0xff]  }
 0x665   : > { %1548 = vmatpush1.bf16.msra.mxu0 %v2821_v58  ;;  %2034 = vmatpush3.bf16.msra.mxu1 %v2827_v1 }
 0x666   : > { %1549 = vmatprep.subr.bf16.mxu0 %v2833_v44  ;;  %2035 = vmatprep.subr.bf16.mxu1 %v2992_v61 }
 0x669   : > { %1550 = vmatpush1.bf16.msra.mxu0 %v2840_v4  ;;  %2036 = vmatpush3.bf16.msra.mxu1 %v2204_v30 }
 0x66a   : > { %1551 = vmatprep.subr.bf16.mxu0 %v2847_v47  ;;  %2037 = vmatprep.subr.bf16.mxu1 %v2992_v61 }
 0x66d   : > { %1552 = vmatpush1.bf16.msra.mxu0 %v2854_v49  ;;  %2038 = vmatpush3.bf16.msra.mxu1 %v2205_v55 }
 0x66e   : > { %1553 = vmatprep.subr.bf16.mxu0 %v2861_v23  ;;  %2039 = vmatprep.subr.bf16.mxu1 %v2992_v61 }
 0x671   : > { %1554 = vmatpush1.bf16.msra.mxu0 %v2868_v60  ;;  %2040 = vmatpush3.bf16.msra.mxu1 %v2206_v57  ;;  %v2995_v60 = vld [vmem:[#allocation5_spill] sm:$0xff] }
 0x672   : > { %1555 = vmatprep.subr.bf16.mxu0 %v2207_v62  ;;  %2041 = vmatprep.subr.bf16.mxu1 %v2992_v61 }
 0x675   : > { %1556 = vmatpush1.bf16.msra.mxu0 %v2208_v0  ;;  %2042 = vmatpush3.bf16.msra.mxu1 %v2209_v8  ;;  %v1651_v0 = vstv %s1650_s17 }
 0x676   : > { %1557 = vmatprep.subr.bf16.mxu0 %v2210_v36  ;;  %2043 = vmatprep.subr.bf16.mxu1 %v2992_v61  ;;  %vm1652_vm10 = vcmp.eq.s32.totalorder %v1651_v0, 1 }
 0x679   : > { %1558 = vmatpush1.bf16.msra.mxu0 %v2211_v16  ;;  %2044 = vmatpush3.bf16.msra.mxu1 %v2212_v40 }
 0x67a   : > { %1559 = vmatprep.subr.bf16.mxu0 %v2213_v43  ;;  %2045 = vmatprep.subr.bf16.mxu1 %v2992_v61 }
 0x67d   : > { %1560 = vmatpush1.bf16.msra.mxu0 %v2214_v24  ;;  %2046 = vmatpush3.bf16.msra.mxu1 %v2215_v51 }
 0x733   : > { %v1463_v48 = vpop.f32.mrb[40].mxu0  ;;  %v1504_v52 = vpop.f32.mrb[32].mxu1 }
 0x734   : > { %v1510_v53 = vadd.f32 %v1463_v48, %v2585_v59  ;;  %v1465_v54 = vpop.f32.mrb[41].mxu0  ;;  %v2029_v5 = vpop.f32.mrb[33].mxu1  ;;  %v1524_v59 = vadd.f32 %v2596_v46, %v1504_v52 }
 0x735   : > { %v1511_v56 = vadd.f32 %v1465_v54, %v2994_v34  ;;  %v1467_v2 = vpop.f32.mrb[42].mxu0  ;;  %v1507_v61 = vpop.f32.mrb[34].mxu1 }
 0x736   : > { %v1789_v41 = vmul.f32 -1.442695, %v1510_v53  ;;  %v1468_v63 = vpop.f32.mrb[43].mxu0  ;;  %v2030_v11 = vpop.f32.mrb[35].mxu1 }
 0x737   : > { %v1790_v58 = vmul.f32 -1.442695, %v1511_v56 }
 0x738   : > { %2172 = vpow2.f32 %v1789_v41 }
 0x739   : > { %2174 = vpow2.f32 %v1790_v58 }
 0x742   : > { %v2173_v1 = vpop.eup %2172 }
 0x743   : > { %v1518_v44 = vadd.f32 1.0, %v2173_v1  ;;  %v2175_v4 = vpop.eup %2174 }
 0x744   : > { %v1519_v47 = vadd.f32 1.0, %v2175_v4 }
 0x745   : > { %2176 = vrcp.f32 %v1518_v44 }
 0x746   : > { %2178 = vrcp.f32 %v1519_v47 }
 0x74f   : > { %v2177_v49 = vpop.eup %2176 }
 0x750   : > { %v1525_v23 = vmul.f32 %v2177_v49, %v1524_v59  ;;  %v2179_v25 = vpop.eup %2178 }
 0x751   : > { %v1528_v27 = vsub.f32 1.0, %v2179_v25  ;;  %v1530_v32 = vmul.f32 %v2179_v25, %v2893_v21 }
 0x752   : > { %v1526_v22 = vadd.f32 %v1525_v23, %v2995_v60 }
 0x754   : > { %2180 = vtanh.f32 %v1526_v22 }
 0x75e   : > { %v2181_v29 = vpop.eup %2180 }
 0x75f   : > { %v1529_v35 = vmul.f32 %v2181_v29, %v1528_v27 }
 0x761   : > { %v1531_v31 = vadd.f32 %v1530_v32, %v1529_v35 }
 0x763   : > { %v1537_v38 = vsel %vm1536_vm9, %v1531_v31, %v2893_v21 }
 0x764   : > { %v1544_v37 = vpack.c.bf16 %v1537_v38, %v1537_v38 }
 0x766   : > { %1578 = vmatmul.mubr.bf16.vlgmr.msra.gmra.mrb[44].mxu0 %v1544_v37  ;;  %2048 = vmatmul.mubr.bf16.vlgmr.msra.gmra.mrb[36].mxu1 %v1544_v37 }
 0x839   : > { %v1579_v33 = vpop.f32.mrb[44].mxu0  ;;  %v1620_v39 = vpop.f32.mrb[36].mxu1 }
 0x83a   : > { %v1626_v26 = vadd.f32 %v1579_v33, %v2996_v50  ;;  %v1581_v13 = vpop.f32.mrb[45].mxu0  ;;  %v2049_v6 = vpop.f32.mrb[37].mxu1  ;;  %v1640_v21 = vadd.f32 %v2596_v46, %v1620_v39 }
 0x83b   : > { %v1627_v42 = vadd.f32 %v1581_v13, %v2591_v20  ;;  %v1583_v7 = vpop.f32.mrb[46].mxu0  ;;  %v1623_v9 = vpop.f32.mrb[38].mxu1  ;;  %v2997_v20 = vld [vmem:[#allocation4_spill] sm:$0xff] }
 0x83c   : > { %v1791_v45 = vmul.f32 -1.442695, %v1626_v26  ;;  %v1584_v10 = vpop.f32.mrb[47].mxu0  ;;  %v2050_v12 = vpop.f32.mrb[39].mxu1 }
 0x83d   : > { %v1792_v14 = vmul.f32 -1.442695, %v1627_v42 }
 0x83e   : > { %2182 = vpow2.f32 %v1791_v45 }
 0x83f   : > { %2184 = vpow2.f32 %v1792_v14 }
 0x848   : > { %v2183_v15 = vpop.eup %2182 }
 0x849   : > { %v1634_v17 = vadd.f32 1.0, %v2183_v15  ;;  %v2185_v18 = vpop.eup %2184 }
 0x84a   : > { %v1635_v19 = vadd.f32 1.0, %v2185_v18 }
 0x84b   : > { %2186 = vrcp.f32 %v1634_v17 }
 0x84c   : > { %2188 = vrcp.f32 %v1635_v19 }
 0x855   : > { %v2187_v3 = vpop.eup %2186 }
 0x856   : > { %v1641_v30 = vmul.f32 %v2187_v3, %v1640_v21  ;;  %v2189_v57 = vpop.eup %2188 }
 0x857   : > { %v1644_v62 = vsub.f32 1.0, %v2189_v57  ;;  %v1646_v16 = vmul.f32 %v2189_v57, %v1537_v38 }
 0x858   : > { %v1642_v55 = vadd.f32 %v1641_v30, %v2997_v20 }
 0x85a   : > { %2190 = vtanh.f32 %v1642_v55 }
 0x864   : > { %v2191_v8 = vpop.eup %2190 }
 0x865   : > { %v1645_v36 = vmul.f32 %v2191_v8, %v1644_v62 }
 0x867   : > { %v1647_v40 = vadd.f32 %v1646_v16, %v1645_v36 }
 0x869   : > { %v1653_v43 = vsel %vm1652_vm10, %v1647_v40, %v1537_v38 }
 0x86a   : > { %1654 = vst [vmem:[#allocation2] sm:$0xff] %v1653_v43  ;;  %1655 = vst [vmem:[%s2983_s5] sm:$0xff] %v1653_v43 }
 0x86b PF: > { %s15_s20 = sadd.s32 1, %s2238_s20   ;;  %s2998_s18 = smov %s2234_s19 }
 0x86c   : > { %p12_p0 = scmp.ge.s32.totalorder %s15_s20, 5   ;;  %s2999_s19 = smov %s3001_s21 }
 0x86e   :  { %14 = sbr.rel (!%p12_p0) target bundleno = 2 (0x2), region = 82 }

</bundles_post_ra>
